<compile_context>
chip_gen: v6e
topology: v6e:2x2x1
jax: 0.10.0
libtpu: 0.0.40
codegen_flags: <defaults>
</compile_context>

<pallas_src>
import functools

import jax
import jax.numpy as jnp
from jax.experimental import pallas as pl
from jax.experimental.pallas import tpu as pltpu

_LANE = 128


def _round_up(x, m):
    return ((x + m - 1) // m) * m


def _vmem_budget_bytes():
    """~75% of physical per-core VMEM: ~48 MiB on v7x, ~96 MiB on v4/v5e/v6e."""
    phys = None
    try:
        info = pltpu.get_tpu_info()
        phys = getattr(info, "vmem_capacity_bytes", None)
    except Exception:
        phys = None
    if phys is None:
        try:
            kind = jax.devices()[0].device_kind.lower()
        except Exception:
            kind = ""
        if any(t in kind for t in ("v4", "v5", "v6")):
            phys = 128 * 1024 * 1024
        else:  # v7x (64 MiB per TensorCore) or unknown: stay conservative.
            phys = 64 * 1024 * 1024
    return (int(phys) * 3) // 4


def _vmem_need_bytes(tm, ti, D, x_isize, o_isize, w_isize):
    """Conservative per-step VMEM estimate for the chosen tiles."""
    # Double-buffered pipeline blocks.
    blocks = 2 * (tm * D * x_isize          # x row tile
                  + tm * D * o_isize        # output row tile
                  + D * 4                   # RMSNorm gain row
                  + D * 2 * ti * w_isize    # fused [w_in | v] tile
                  + ti * D * w_isize)       # w_out tile
    # Persistent scratch (normed MXU lhs + f32 accumulator).
    scratch = tm * D * (w_isize + 4)
    # In-kernel f32 temporaries (proj, gate/up slices, h, casts).
    temps = 8 * tm * ti * 4 + 2 * tm * D * 4
    return blocks + scratch + temps


def _plan_tiles(D, I_pad, x_isize, o_isize, w_isize, budget):
    """Pick (row_tile_target, interm_tile) under the VMEM budget.

    Prefer nk == 1 (weights resident across all row blocks, fetched once total);
    otherwise keep the largest row tile that fits (weight HBM traffic ~ rows/tm)
    and shrink the intermediate tile.
    """
    tm_cands = (512, 256, 128, 64, 32, 16, 8)
    ti_cands = [I_pad] + [t for t in (1024, 512, 256, 128) if t < I_pad and I_pad % t == 0]
    for ti in ti_cands:
        for tm in tm_cands:
            if _vmem_need_bytes(tm, ti, D, x_isize, o_isize, w_isize) <= budget:
                return tm, ti
    # Smallest bounded configuration (128 always divides the padded I).
    return tm_cands[-1], ti_cands[-1]


def _residual_ffn_kernel(x_ref, g_ref, wg_ref, wo_ref, o_ref,
                         normed_ref, acc_ref, *, inv_scale, inv_eps, interm_tile):
    k = pl.program_id(1)

    @pl.when(k == 0)
    def _init():
        xf = x_ref[...].astype(jnp.float32)
        # RMSNorm as in the torch module: x / max(||x||_2 * dim**-0.5, eps) * g.
        # 1/max(sqrt(ss)*scale, eps) == min(rsqrt(ss)*sqrt(dim), 1/eps): EUP rsqrt, no divide.
        ss = jnp.sum(xf * xf, axis=-1, keepdims=True)
        inv = jnp.minimum(jax.lax.rsqrt(ss) * inv_scale, inv_eps)
        normed = (xf * inv) * g_ref[...].astype(jnp.float32)
        normed_ref[...] = normed.astype(normed_ref.dtype)  # MXU lhs in the weight dtype
        acc_ref[...] = xf                                   # seed accumulator with the residual

    # ---- SwiGLU over this intermediate tile (one fused gate|up matmul) ----
    normed = normed_ref[...]                                # (TM, D)
    proj = jnp.dot(normed, wg_ref[...], preferred_element_type=jnp.float32)  # (TM, 2*tI)
    a = proj[:, :interm_tile]
    b = proj[:, interm_tile:]
    h = (a * jax.nn.sigmoid(a)) * b                         # silu(w_in x) * (v x), f32
    acc_ref[...] += jnp.dot(h.astype(wo_ref.dtype), wo_ref[...],
                            preferred_element_type=jnp.float32)

    # ---- Dropout (identity in eval) + residual (already seeded), final store ----
    # TODO(synk): training-mode dropout (pltpu.prng_random_bits mask) not implemented; eval only.
    @pl.when(k == pl.num_programs(1) - 1)
    def _finalize():
        o_ref[...] = acc_ref[...].astype(o_ref.dtype)


def make_residual_ffn(g, w_in, v, w_out, *, eps=1e-8, interm_tile=None):
    """One-time parameter prep for the eval-mode ResidualFFN kernel.

    g:     (D,)   RMSNorm gain
    w_in:  (D, I) pre-transposed Linear weight (in, out)
    v:     (D, I) pre-transposed
    w_out: (I, D) pre-transposed

    Returns apply(x) with x of shape (..., D).  Weight fusion and the tiling plan run
    exactly once here, not on every forward call.
    """
    D, I = w_in.shape
    assert v.shape == (D, I) and w_out.shape == (I, D) and g.shape == (D,)
    w_dtype = w_in.dtype
    w_isize = jnp.dtype(w_dtype).itemsize

    # Pad the intermediate dim to a lane multiple.  The zero gate/up columns give
    # silu(0) * 0 = 0 and hit zero rows of w_out, so the result is unchanged; this also
    # guarantees a bounded 128-multiple intermediate tile always exists.
    I_pad = _round_up(I, _LANE)
    if I_pad != I:
        p = I_pad - I
        w_in = jnp.pad(w_in, ((0, 0), (0, p)))
        v = jnp.pad(v, ((0, 0), (0, p)))
        w_out = jnp.pad(w_out, ((0, p), (0, 0)))

    budget = _vmem_budget_bytes()
    tm_target, ti = _plan_tiles(D, I_pad, 4, 4, w_isize, budget)  # plan with f32 activations (worst case)
    if interm_tile is not None:
        assert interm_tile % _LANE == 0 and I_pad % interm_tile == 0
        ti = int(interm_tile)
    nk = I_pad // ti

    # Fuse gate/up projections once: tile k holds [w_in[:, k*ti:(k+1)*ti] | v[:, ...]].
    wg = jnp.concatenate([w_in.reshape(D, nk, ti), v.reshape(D, nk, ti)], axis=-1)
    wg = jnp.transpose(wg, (1, 0, 2))               # (nk, D, 2*ti), built once here
    g2d = g.reshape(1, D)

    kernel = functools.partial(_residual_ffn_kernel,
                               inv_scale=float(D) ** 0.5,
                               inv_eps=1.0 / float(eps),
                               interm_tile=ti)

    def apply(x):
        orig_shape = x.shape
        assert orig_shape[-1] == D
        rows = 1
        for s in orig_shape[:-1]:
            rows *= s
        x2d = x.reshape(rows, D)
        out_dt = x.dtype

        # Row tile: dtype-native sublane multiple, capped by the planned target.
        sub = {1: 32, 2: 16}.get(jnp.dtype(x.dtype).itemsize, 8)
        rows_r = _round_up(rows, sub)
        tm = min(tm_target, rows_r)
        tm = max(sub, (tm // sub) * sub)
        # Keep >= 2 row blocks when there are enough rows so the "parallel" row axis can
        # be sharded across both v7x TensorCores (no-op once rows >> tm_target).
        if rows_r >= 2 * _LANE:
            tm = min(tm, _round_up(rows_r // 2, sub))

        rows_pad = _round_up(rows, tm)
        if rows_pad != rows:
            # Padded zero rows: ss == 0 -> inv clamps to 1/eps -> normed == 0; sliced off below.
            x2d = jnp.pad(x2d, ((0, rows_pad - rows), (0, 0)))
        grid = (rows_pad // tm, nk)

        need = _vmem_need_bytes(tm, ti, D, x2d.dtype.itemsize,
                                jnp.dtype(out_dt).itemsize, w_isize)
        vmem_limit = int(min(budget, max(32 << 20, 2 * need + (4 << 20))))

        x_bytes = rows_pad * D * (x2d.dtype.itemsize + jnp.dtype(out_dt).itemsize)
        w_bytes = (wg.size + w_out.size) * w_isize
        cost = pl.CostEstimate(
            flops=int(2 * rows_pad * D * 2 * I_pad + 2 * rows_pad * I_pad * D
                      + 4 * rows_pad * I_pad),
            transcendentals=int(rows_pad * I_pad + rows_pad),
            bytes_accessed=int(x_bytes + (w_bytes if nk == 1 else grid[0] * w_bytes)),
        )

        out2d = pl.pallas_call(
            kernel,
            out_shape=jax.ShapeDtypeStruct((rows_pad, D), out_dt),
            grid_spec=pltpu.PrefetchScalarGridSpec(
                num_scalar_prefetch=0,
                grid=grid,
                in_specs=[
                    pl.BlockSpec((tm, D), lambda i, k: (i, 0)),               # x rows (resident over k)
                    pl.BlockSpec((1, D), lambda i, k: (0, 0)),                # RMSNorm gain
                    pl.BlockSpec((None, D, 2 * ti), lambda i, k: (k, 0, 0)),  # fused [w_in | v] tile
                    pl.BlockSpec((ti, D), lambda i, k: (k, 0)),               # w_out tile
                ],
                out_specs=pl.BlockSpec((tm, D), lambda i, k: (i, 0)),
                scratch_shapes=[
                    pltpu.VMEM((tm, D), w_dtype),      # normed activations (MXU lhs)
                    pltpu.VMEM((tm, D), jnp.float32),  # f32 accumulator seeded with residual
                ],
            ),
            compiler_params=pltpu.CompilerParams(
                dimension_semantics=("parallel", "arbitrary"),
                vmem_limit_bytes=vmem_limit,
            ),
            cost_estimate=cost,
        )(x2d, g2d, wg, w_out)

        if rows_pad != rows:
            out2d = out2d[:rows]
        return out2d.reshape(orig_shape)

    return apply


def reference_residual_ffn(x, g, w_in, v, w_out, eps=1e-8):
    """Pure-JAX reference mirroring the PyTorch module (eval mode)."""
    D = x.shape[-1]
    scale = D ** (-0.5)
    norm = jnp.linalg.norm(x, axis=-1, keepdims=True) * scale
    normed = x / jnp.maximum(norm, eps) * g
    a = normed @ w_in
    b = normed @ v
    h = (a * jax.nn.sigmoid(a)) * b
    return h @ w_out + x


if __name__ == "__main__":
    # Small shapes consistent with the module; D, I multiples of 128 so stores are lane-dense.
    B, S, D, I = 2, 64, 128, 256
    key = jax.random.PRNGKey(0)
    kx, k1, k2, k3, k4 = jax.random.split(key, 5)

    x = jax.random.normal(kx, (B, S, D), dtype=jnp.float32)

    # Deterministic synthetic parameters. PyTorch Linear weight is (out, in);
    # we store the transposed (in, out) version directly.
    g = 1.0 + 0.05 * jax.random.normal(k4, (D,), dtype=jnp.float32)
    w_in = jax.random.normal(k1, (D, I), dtype=jnp.float32) * (D ** -0.5)
    v = jax.random.normal(k2, (D, I), dtype=jnp.float32) * (D ** -0.5)
    w_out = jax.random.normal(k3, (I, D), dtype=jnp.float32) * (I ** -0.5)

    # One-time prep (weight fusion + tiling plan), then forward calls.
    ffn = make_residual_ffn(g, w_in, v, w_out)
    out = jax.block_until_ready(ffn(x))
    ref = reference_residual_ffn(x, g, w_in, v, w_out)
    assert out.shape == (B, S, D)
    assert jnp.allclose(out, ref, atol=1e-4, rtol=1e-4), "mismatch vs reference"

    # Secondary check: row padding (rows not a multiple of the tile) and the
    # intermediate-dim accumulation loop (forced nk = 2).
    ffn_tiled = make_residual_ffn(g, w_in, v, w_out, interm_tile=128)
    x_small = jax.random.normal(jax.random.PRNGKey(7), (2, 5, D), dtype=jnp.float32)
    out_small = jax.block_until_ready(ffn_tiled(x_small))
    ref_small = reference_residual_ffn(x_small, g, w_in, v, w_out)
    assert out_small.shape == x_small.shape
    assert jnp.allclose(out_small, ref_small, atol=1e-4, rtol=1e-4), "mismatch (tiled path)"

    print("KERNEL_OK")
</pallas_src>

<mosaic_0001>
module attributes {stable_mosaic.version = 11 : i64} {
  func.func @_residual_ffn_kernel(%arg0: i32, %arg1: i32, %arg2: memref<128x128xf32, #tpu.memory_space<vmem>>, %arg3: memref<1x128xf32, #tpu.memory_space<vmem>>, %arg4: memref<1x128x512xf32, #tpu.memory_space<vmem>>, %arg5: memref<256x128xf32, #tpu.memory_space<vmem>>, %arg6: memref<128x128xf32, #tpu.memory_space<vmem>>, %arg7: memref<128x128xf32, #tpu.memory_space<vmem>>, %arg8: memref<128x128xf32, #tpu.memory_space<vmem>>) attributes {dimension_semantics = [#tpu.dimension_semantics<parallel>, #tpu.dimension_semantics<arbitrary>], iteration_bounds = array<i64: 1, 1>, scalar_prefetch = 0 : i64, scratch_operands = 2 : i64, tpu.core_type = #tpu.core_type<tc>, window_params = [{transform_indices = @transform_0, window_bounds = array<i64: 128, 128>}, {pipeline_mode = #tpu.pipeline_mode<synchronous>, transform_indices = @transform_1, window_bounds = array<i64: 1, 128>}, {transform_indices = @transform_2, window_bounds = array<i64: 1, 128, 512>}, {transform_indices = @transform_3, window_bounds = array<i64: 256, 128>}, {transform_indices = @transform_4, window_bounds = array<i64: 128, 128>}]} {
    %c0_i32 = arith.constant 0 : i32
    %0 = arith.cmpi eq, %arg1, %c0_i32 : i32
    %1 = arith.extui %0 : i1 to i32
    %c0_i32_0 = arith.constant 0 : i32
    %2 = arith.cmpi ne, %1, %c0_i32_0 : i32
    scf.if %2 {
      %c0_15 = arith.constant 0 : index
      %c0_16 = arith.constant 0 : index
      %24 = vector.load %arg2[%c0_15, %c0_16] : memref<128x128xf32, #tpu.memory_space<vmem>>, vector<128x128xf32>
      %25 = arith.mulf %24, %24 : vector<128x128xf32>
      %cst_17 = arith.constant dense<0.000000e+00> : vector<128xf32>
      %26 = vector.multi_reduction <add>, %25, %cst_17 [1] : vector<128x128xf32> to vector<128xf32>
      %27 = vector.shape_cast %26 : vector<128xf32> to vector<128x1xf32>
      %28 = math.rsqrt %27 : vector<128x1xf32>
      %cst_18 = arith.constant 11.3137083 : f32
      %29 = vector.broadcast %cst_18 : f32 to vector<128x1xf32>
      %30 = arith.mulf %28, %29 : vector<128x1xf32>
      %cst_19 = arith.constant 1.000000e+08 : f32
      %31 = vector.broadcast %cst_19 : f32 to vector<128x1xf32>
      %32 = arith.minimumf %30, %31 : vector<128x1xf32>
      %33 = vector.broadcast %32 : vector<128x1xf32> to vector<128x128xf32>
      %34 = arith.mulf %24, %33 : vector<128x128xf32>
      %c0_20 = arith.constant 0 : index
      %c0_21 = arith.constant 0 : index
      %35 = vector.load %arg3[%c0_20, %c0_21] : memref<1x128xf32, #tpu.memory_space<vmem>>, vector<1x128xf32>
      %36 = vector.broadcast %35 : vector<1x128xf32> to vector<128x128xf32>
      %37 = arith.mulf %34, %36 : vector<128x128xf32>
      %c0_22 = arith.constant 0 : index
      %c0_23 = arith.constant 0 : index
      %38 = vector.load %arg7[%c0_22, %c0_23] : memref<128x128xf32, #tpu.memory_space<vmem>>, vector<128x128xf32>
      tpu.vector_store %arg7[%c0_22, %c0_23], %37 {strides = array<i32>} : memref<128x128xf32, #tpu.memory_space<vmem>>, vector<128x128xf32>,
      %c0_24 = arith.constant 0 : index
      %c0_25 = arith.constant 0 : index
      %39 = vector.load %arg8[%c0_24, %c0_25] : memref<128x128xf32, #tpu.memory_space<vmem>>, vector<128x128xf32>
      tpu.vector_store %arg8[%c0_24, %c0_25], %24 {strides = array<i32>} : memref<128x128xf32, #tpu.memory_space<vmem>>, vector<128x128xf32>,
    } else {
    }
    %c0 = arith.constant 0 : index
    %c0_1 = arith.constant 0 : index
    %3 = vector.load %arg7[%c0, %c0_1] : memref<128x128xf32, #tpu.memory_space<vmem>>, vector<128x128xf32>
    %c0_2 = arith.constant 0 : index
    %c0_3 = arith.constant 0 : index
    %c0_4 = arith.constant 0 : index
    %4 = vector.load %arg4[%c0_2, %c0_3, %c0_4] : memref<1x128x512xf32, #tpu.memory_space<vmem>>, vector<1x128x512xf32>
    %5 = vector.shape_cast %4 : vector<1x128x512xf32> to vector<128x512xf32>
    %cst = arith.constant dense<0.000000e+00> : vector<128x512xf32>
    %6 = tpu.matmul %3, %5, %cst {dimension_numbers = #tpu.dot_dimension_numbers<[1], [0], [0], [1], [0, 0, 1, 1], [], []>} : vector<128x128xf32>, vector<128x512xf32>, vector<128x512xf32> -> vector<128x512xf32>
    %7 = vector.extract_strided_slice %6 {offsets = [0, 0], sizes = [128, 256], strides = [1, 1]} : vector<128x512xf32> to vector<128x256xf32>
    %8 = vector.extract_strided_slice %6 {offsets = [0, 256], sizes = [128, 256], strides = [1, 1]} : vector<128x512xf32> to vector<128x256xf32>
    %9 = arith.negf %7 : vector<128x256xf32>
    %10 = math.exp %9 : vector<128x256xf32>
    %cst_5 = arith.constant 1.000000e+00 : f32
    %11 = vector.broadcast %cst_5 : f32 to vector<128x256xf32>
    %12 = arith.addf %11, %10 : vector<128x256xf32>
    %13 = arith.divf %11, %12 : vector<128x256xf32>
    %14 = arith.mulf %7, %13 : vector<128x256xf32>
    %15 = arith.mulf %14, %8 : vector<128x256xf32>
    %c0_6 = arith.constant 0 : index
    %c0_7 = arith.constant 0 : index
    %16 = vector.load %arg8[%c0_6, %c0_7] : memref<128x128xf32, #tpu.memory_space<vmem>>, vector<128x128xf32>
    %c0_8 = arith.constant 0 : index
    %c0_9 = arith.constant 0 : index
    %17 = vector.load %arg5[%c0_8, %c0_9] : memref<256x128xf32, #tpu.memory_space<vmem>>, vector<256x128xf32>
    %cst_10 = arith.constant dense<0.000000e+00> : vector<128x128xf32>
    %18 = tpu.matmul %15, %17, %cst_10 {dimension_numbers = #tpu.dot_dimension_numbers<[1], [0], [0], [1], [0, 0, 1, 1], [], []>} : vector<128x256xf32>, vector<256x128xf32>, vector<128x128xf32> -> vector<128x128xf32>
    %19 = arith.addf %16, %18 : vector<128x128xf32>
    %c0_11 = arith.constant 0 : index
    %c0_12 = arith.constant 0 : index
    %20 = vector.load %arg8[%c0_11, %c0_12] : memref<128x128xf32, #tpu.memory_space<vmem>>, vector<128x128xf32>
    tpu.vector_store %arg8[%c0_11, %c0_12], %19 {strides = array<i32>} : memref<128x128xf32, #tpu.memory_space<vmem>>, vector<128x128xf32>,
    %c0_i32_13 = arith.constant 0 : i32
    %21 = arith.cmpi eq, %arg1, %c0_i32_13 : i32
    %22 = arith.extui %21 : i1 to i32
    %c0_i32_14 = arith.constant 0 : i32
    %23 = arith.cmpi ne, %22, %c0_i32_14 : i32
    scf.if %23 {
      %c0_15 = arith.constant 0 : index
      %c0_16 = arith.constant 0 : index
      %24 = vector.load %arg8[%c0_15, %c0_16] : memref<128x128xf32, #tpu.memory_space<vmem>>, vector<128x128xf32>
      %c0_17 = arith.constant 0 : index
      %c0_18 = arith.constant 0 : index
      %25 = vector.load %arg6[%c0_17, %c0_18] : memref<128x128xf32, #tpu.memory_space<vmem>>, vector<128x128xf32>
      tpu.vector_store %arg6[%c0_17, %c0_18], %24 {strides = array<i32>} : memref<128x128xf32, #tpu.memory_space<vmem>>, vector<128x128xf32>,
    } else {
    }
    return
  }
  func.func @transform_0(%arg0: i32, %arg1: i32) -> (i32, i32) {
    %c0_i32 = arith.constant 0 : i32
    %c0_i32_0 = arith.constant 0 : i32
    return %arg0, %c0_i32 : i32, i32
  }
  func.func @transform_1(%arg0: i32, %arg1: i32) -> (i32, i32) {
    %c0_i32 = arith.constant 0 : i32
    %c0_i32_0 = arith.constant 0 : i32
    %c0_i32_1 = arith.constant 0 : i32
    return %c0_i32, %c0_i32_0 : i32, i32
  }
  func.func @transform_2(%arg0: i32, %arg1: i32) -> (i32, i32, i32) {
    %c0_i32 = arith.constant 0 : i32
    %c0_i32_0 = arith.constant 0 : i32
    %c0_i32_1 = arith.constant 0 : i32
    return %arg1, %c0_i32, %c0_i32_0 : i32, i32, i32
  }
  func.func @transform_3(%arg0: i32, %arg1: i32) -> (i32, i32) {
    %c0_i32 = arith.constant 0 : i32
    %c0_i32_0 = arith.constant 0 : i32
    return %arg1, %c0_i32 : i32, i32
  }
  func.func @transform_4(%arg0: i32, %arg1: i32) -> (i32, i32) {
    %c0_i32 = arith.constant 0 : i32
    %c0_i32_0 = arith.constant 0 : i32
    return %arg0, %c0_i32 : i32, i32
  }
}

</mosaic_0001>

<bundles_post_ra>
// kernel: tpu_custom_call.1
= control target key start
LH: loop header
LB: loop body
LE: loop exit
PB: predicated region body
PF: predicated region fallthrough
CT: control target
= control target key end

     0   :  { %9 = vsyncpa [#allocation5], 0  ;;  %s1987_s0 = inlined_call_operand.hbm [shape: f32[128,128], index: 0, kind: input, shape index: {}]   ;;  %s1988_s1 = inlined_call_operand.vmem [shape: f32[1,128], index: 1, kind: input, shape index: {}]   ;;  %s1989_s2 = inlined_call_operand.hbm [shape: f32[1,128,512], index: 2, kind: input, shape index: {}]   ;;  %s1990_s3 = inlined_call_operand.hbm [shape: f32[256,128], index: 3, kind: input, shape index: {}]   ;;  %s1991_s4 = inlined_call_operand.hbm [shape: f32[128,128], index: 4, kind: output, shape index: {}]  }
   0x1   :  { %10 = vsyncpa [#allocation8], 0 }
   0x2   :  { %11 = vsyncpa [#allocation6], 0  ;;  %s1598_s15 = smov [#allocation7]  }
   0x3   :  { %s31_s16 = sshll.u32 %s1598_s15, 4  ;;  %s32_s16 = int_to_ptr.vmem [resolvable:$true] %s31_s16 }
   0x4   :  { %s1520_s17 = scalar_lea.vmem %s32_s16, 8192  ;;  %p1525_p1 = scmp.lt.s32.totalorder %s32_s16, %s32_s16 }
   0x5   :  { %p1521_p0 = scmp.ne.s32.totalorder %s32_s16, %s1520_s17  ;;  %p1526_p2 = scmp.lt.s32.totalorder %s1520_s17, %s1520_s17 }
   0x7   :  { %p1527_p3 = por %p1526_p2, %p1525_p1 }
   0x9   :  { %p1528_p4 = pnand %p1527_p3, %p1521_p0 }
   0xb   :  { %1531 = shalt.err (!%p1528_p4)
}
   0xc   :  { %s1599_s18 = smov 512   ;;  %s1600_s19 = smov 32  }
   0xd   :  { %37 = dma.hbm_to_vmem [thread:$0]  %s1989_s2, 8192, %s32_s16, [#allocation8], %s1599_s18, %s1599_s18, %s1600_s19  }
   0xe   :  { %s1601_s22 = smov [#allocation4]  }
   0xf   :  { %s17_s23 = sshll.u32 %s1601_s22, 4  ;;  %s18_s23 = int_to_ptr.vmem [resolvable:$true] %s17_s23 }
  0x10   :  { %s1540_s24 = scalar_lea.vmem %s18_s23, 2048  ;;  %p1545_p6 = scmp.lt.s32.totalorder %s18_s23, %s18_s23 }
  0x11   :  { %p1541_p5 = scmp.ne.s32.totalorder %s18_s23, %s1540_s24  ;;  %p1546_p7 = scmp.lt.s32.totalorder %s1540_s24, %s1540_s24 }
  0x13   :  { %p1547_p8 = por %p1546_p7, %p1545_p6 }
  0x15   :  { %p1548_p9 = pnand %p1547_p8, %p1541_p5 }
  0x17   :  { %1551 = shalt.err (!%p1548_p9)
}
  0x18   :  { %s1602_s25 = smov 128   ;;  %s1603_s26 = smov 8  }
  0x19   :  { %23 = dma.hbm_to_vmem [thread:$0]  %s1987_s0, 2048, %s18_s23, [#allocation5], %s1602_s25, %s1602_s25, %s1603_s26  }
  0x1a   :  { %s1604_s2 = smov [#allocation9]  }
  0x1b   :  { %s43_s29 = sshll.u32 %s1604_s2, 4  ;;  %s44_s29 = int_to_ptr.vmem [resolvable:$true] %s43_s29 }
  0x1c   :  { %s1560_s30 = scalar_lea.vmem %s44_s29, 4096  ;;  %p1565_p11 = scmp.lt.s32.totalorder %s44_s29, %s44_s29 }
  0x1d   :  { %p1561_p10 = scmp.ne.s32.totalorder %s44_s29, %s1560_s30  ;;  %p1566_p12 = scmp.lt.s32.totalorder %s1560_s30, %s1560_s30 }
  0x1f   :  { %p1567_p13 = por %p1566_p12, %p1565_p11 }
  0x21   :  { %p1568_p0 = pnand %p1567_p13, %p1561_p10 }
  0x23   :  { %1571 = shalt.err (!%p1568_p0)
}
  0x24   :  { %49 = dma.hbm_to_vmem [thread:$0]  %s1990_s3, 4096, %s44_s29, [#allocation8], %s1602_s25, %s1602_s25, %s1603_s26  }
  0x25   :  { %1592 = dma.done.wait [#allocation5], 2048  }
  0x26   :  { %1593 = vsyncadd [#allocation5], 4294965248 }
  0x27   :  { %1594 = dma.done.wait [#allocation8], 12288  }
  0x28   :  { %1595 = vsyncadd [#allocation8], 4294955008  ;;  %v1647_v0 = vld [vmem:[#allocation4] sm:$0xff]  ;;  %v1649_v1 = vld [vmem:[#allocation4 + $0x8] sm:$0xff] }
  0x29   :  { %v1651_v2 = vld [vmem:[#allocation4 + $0x40] sm:$0xff]  ;;  %v79_v3 = vmul.f32 %v1647_v0, %v1647_v0  ;;  %v80_v4 = vmul.f32 %v1649_v1, %v1649_v1  ;;  %v1657_v5 = vld [vmem:[#allocation4 + $0x48] sm:$0xff]  ;;  %v1663_v8 = vld [vmem:[#allocation4 + $0x10] sm:$0xff] }
  0x2a   :  { %v87_v6 = vmul.f32 %v1651_v2, %v1651_v2  ;;  %v88_v7 = vmul.f32 %v1657_v5, %v1657_v5  ;;  %v1665_v9 = vld [vmem:[#allocation4 + $0x50] sm:$0xff]  ;;  %v323_v10 = vld [vmem:[#allocation7 + $0x1e8] sm:$0xff]  ;;  %v322_v11 = vld [vmem:[#allocation7 + $0x1e0] sm:$0xff]  ;;  %v81_v13 = vmul.f32 %v1663_v8, %v1663_v8 }
  0x2b   :  { %95 = vadd.xlane.f32.xlu0 %v79_v3  ;;  %97 = vadd.xlane.f32.xlu1 %v80_v4  ;;  %v319_v12 = vld [vmem:[#allocation7 + $0x1c8] sm:$0xff]  ;;  %v89_v14 = vmul.f32 %v1665_v9, %v1665_v9  ;;  %v318_v15 = vld [vmem:[#allocation7 + $0x1c0] sm:$0xff]  ;;  %v1671_v16 = vld [vmem:[#allocation4 + $0x18] sm:$0xff]  ;;  %v1605_v3 = vmov 0.0  }
  0x2c   :  { %326 = vmatprep.subr.mxu0 %v323_v10  ;;  %1295 = vmatprep.subr.mxu1 %v323_v10  ;;  %v1673_v17 = vld [vmem:[#allocation4 + $0x58] sm:$0xff]  ;;  %v315_v18 = vld [vmem:[#allocation7 + $0x1a8] sm:$0xff]  ;;  %v314_v19 = vld [vmem:[#allocation7 + $0x1a0] sm:$0xff]  ;;  %v82_v20 = vmul.f32 %v1671_v16, %v1671_v16 }
  0x2d   :  { %327 = vmatpush1.msra.mxu0 %v322_v11  ;;  %1311 = vmatpush1.msra.mxu1 %v322_v11  ;;  %v90_v21 = vmul.f32 %v1673_v17, %v1673_v17  ;;  %v311_v22 = vld [vmem:[#allocation7 + $0x188] sm:$0xff]  ;;  %v1679_v23 = vld [vmem:[#allocation4 + $0x20] sm:$0xff]  ;;  %v1695_v37 = vld [vmem:[#allocation4 + $0x30] sm:$0xff] }
  0x2e   :  { %328 = vmatprep.subr.mxu0 %v319_v12  ;;  %1296 = vmatprep.subr.mxu1 %v319_v12  ;;  %v1681_v24 = vld [vmem:[#allocation4 + $0x60] sm:$0xff]  ;;  %v307_v26 = vld [vmem:[#allocation7 + $0x168] sm:$0xff]  ;;  %v83_v27 = vmul.f32 %v1679_v23, %v1679_v23  ;;  %v1697_v38 = vld [vmem:[#allocation4 + $0x70] sm:$0xff]  ;;  %v85_v41 = vmul.f32 %v1695_v37, %v1695_v37 }
  0x2f   :  { %111 = vadd.xlane.f32.xlu0 %v87_v6  ;;  %113 = vadd.xlane.f32.xlu1 %v88_v7  ;;  %v310_v25 = vld [vmem:[#allocation7 + $0x180] sm:$0xff]  ;;  %v91_v28 = vmul.f32 %v1681_v24, %v1681_v24  ;;  %v1687_v30 = vld [vmem:[#allocation4 + $0x28] sm:$0xff]  ;;  %v93_v42 = vmul.f32 %v1697_v38, %v1697_v38  ;;  %v1703_v44 = vld [vmem:[#allocation4 + $0x38] sm:$0xff] }
  0x30   :  { %329 = vmatpush1.msra.mxu0 %v318_v15  ;;  %1312 = vmatpush1.msra.mxu1 %v318_v15  ;;  %v306_v29 = vld [vmem:[#allocation7 + $0x160] sm:$0xff]  ;;  %v1689_v31 = vld [vmem:[#allocation4 + $0x68] sm:$0xff]  ;;  %v84_v34 = vmul.f32 %v1687_v30, %v1687_v30  ;;  %v1705_v45 = vld [vmem:[#allocation4 + $0x78] sm:$0xff]  ;;  %v86_v48 = vmul.f32 %v1703_v44, %v1703_v44 }
  0x31   :  { %330 = vmatprep.subr.mxu0 %v315_v18  ;;  %1297 = vmatprep.subr.mxu1 %v315_v18  ;;  %v303_v32 = vld [vmem:[#allocation7 + $0x148] sm:$0xff]  ;;  %v302_v33 = vld [vmem:[#allocation7 + $0x140] sm:$0xff]  ;;  %v92_v35 = vmul.f32 %v1689_v31, %v1689_v31  ;;  %v94_v49 = vmul.f32 %v1705_v45, %v1705_v45  ;;  %v325_v4 = vld [vmem:[#allocation7 + $0x1f8] sm:$0xff] }
  0x32   :  { %331 = vmatpush1.msra.mxu0 %v314_v19  ;;  %1313 = vmatpush1.msra.mxu1 %v314_v19  ;;  %v299_v36 = vld [vmem:[#allocation7 + $0x128] sm:$0xff]  ;;  %v298_v39 = vld [vmem:[#allocation7 + $0x120] sm:$0xff] }
  0x33   :  { %99 = vadd.xlane.f32.xlu0 %v81_v13  ;;  %115 = vadd.xlane.f32.xlu1 %v89_v14  ;;  %v295_v40 = vld [vmem:[#allocation7 + $0x108] sm:$0xff]  ;;  %v294_v43 = vld [vmem:[#allocation7 + $0x100] sm:$0xff] }
  0x34   :  { %332 = vmatprep.subr.mxu0 %v311_v22  ;;  %1298 = vmatprep.subr.mxu1 %v311_v22  ;;  %v291_v46 = vld [vmem:[#allocation7 + $0xe8] sm:$0xff]  ;;  %v290_v47 = vld [vmem:[#allocation7 + $0xe0] sm:$0xff] }
  0x35   :  { %333 = vmatpush1.msra.mxu0 %v310_v25  ;;  %1314 = vmatpush1.msra.mxu1 %v310_v25  ;;  %v287_v50 = vld [vmem:[#allocation7 + $0xc8] sm:$0xff]  ;;  %v286_v51 = vld [vmem:[#allocation7 + $0xc0] sm:$0xff] }
  0x36   :  { %334 = vmatprep.subr.mxu0 %v307_v26  ;;  %1299 = vmatprep.subr.mxu1 %v307_v26  ;;  %v283_v52 = vld [vmem:[#allocation7 + $0xa8] sm:$0xff]  ;;  %v282_v53 = vld [vmem:[#allocation7 + $0xa0] sm:$0xff] }
  0x37   :  { %101 = vadd.xlane.f32.xlu0 %v82_v20  ;;  %117 = vadd.xlane.f32.xlu1 %v90_v21  ;;  %v279_v54 = vld [vmem:[#allocation7 + $0x88] sm:$0xff]  ;;  %v278_v55 = vld [vmem:[#allocation7 + $0x80] sm:$0xff] }
  0x38   :  { %335 = vmatpush1.msra.mxu0 %v306_v29  ;;  %1315 = vmatpush1.msra.mxu1 %v306_v29  ;;  %v275_v56 = vld [vmem:[#allocation7 + $0x68] sm:$0xff]  ;;  %v274_v57 = vld [vmem:[#allocation7 + $0x60] sm:$0xff] }
  0x39   :  { %336 = vmatprep.subr.mxu0 %v303_v32  ;;  %1300 = vmatprep.subr.mxu1 %v303_v32  ;;  %v271_v58 = vld [vmem:[#allocation7 + $0x48] sm:$0xff]  ;;  %v270_v59 = vld [vmem:[#allocation7 + $0x40] sm:$0xff] }
  0x3a   :  { %337 = vmatpush1.msra.mxu0 %v302_v33  ;;  %1316 = vmatpush1.msra.mxu1 %v302_v33  ;;  %v267_v60 = vld [vmem:[#allocation7 + $0x28] sm:$0xff]  ;;  %v266_v61 = vld [vmem:[#allocation7 + $0x20] sm:$0xff] }
  0x3b   :  { %103 = vadd.xlane.f32.xlu0 %v83_v27  ;;  %119 = vadd.xlane.f32.xlu1 %v91_v28  ;;  %v263_v62 = vld [vmem:[#allocation7 + $0x8] sm:$0xff]  ;;  %v262_v63 = vld [vmem:[#allocation7] sm:$0xff] }
  0x3c   :  { %338 = vmatprep.subr.mxu0 %v299_v36  ;;  %1301 = vmatprep.subr.mxu1 %v299_v36  ;;  %v1716_v29 = vld [vmem:[%s1988_s1] ss:$0 sm:$0xff]  ;;  %s1606_s1 = smov [#allocation10]  }
  0x3d   :  { %339 = vmatpush1.msra.mxu0 %v298_v39  ;;  %1317 = vmatpush1.msra.mxu1 %v298_v39  ;;  %s1169_s7 = sshll.u32 %s1606_s1, 4  ;;  %s1170_s7 = int_to_ptr.vmem [resolvable:$true] %s1169_s7 }
  0x3e   :  { %340 = vmatprep.subr.mxu0 %v295_v40  ;;  %1302 = vmatprep.subr.mxu1 %v295_v40  ;;  %s1572_s8 = scalar_lea.vmem %s1170_s7, 2048  ;;  %p1577_p2 = scmp.lt.s32.totalorder %s1170_s7, %s1170_s7 }
  0x3f   :  { %105 = vadd.xlane.f32.xlu0 %v84_v34  ;;  %121 = vadd.xlane.f32.xlu1 %v92_v35  ;;  %p1573_p1 = scmp.ne.s32.totalorder %s1170_s7, %s1572_s8  ;;  %p1578_p3 = scmp.lt.s32.totalorder %s1572_s8, %s1572_s8 }
  0x40   :  { %341 = vmatpush1.msra.mxu0 %v294_v43  ;;  %1318 = vmatpush1.msra.mxu1 %v294_v43 }
  0x41   :  { %342 = vmatprep.subr.mxu0 %v291_v46  ;;  %1303 = vmatprep.subr.mxu1 %v291_v46  ;;  %p1579_p4 = por %p1578_p3, %p1577_p2 }
  0x42   :  { %343 = vmatpush1.msra.mxu0 %v290_v47  ;;  %1319 = vmatpush1.msra.mxu1 %v290_v47 }
  0x43   :  { %107 = vadd.xlane.f32.xlu0 %v85_v41  ;;  %123 = vadd.xlane.f32.xlu1 %v93_v42  ;;  %p1580_p5 = pnand %p1579_p4, %p1573_p1 }
  0x44   :  { %344 = vmatprep.subr.mxu0 %v287_v50  ;;  %1304 = vmatprep.subr.mxu1 %v287_v50 }
  0x45   :  { %345 = vmatpush1.msra.mxu0 %v286_v51  ;;  %1320 = vmatpush1.msra.mxu1 %v286_v51 }
  0x46   :  { %346 = vmatprep.subr.mxu0 %v283_v52  ;;  %1305 = vmatprep.subr.mxu1 %v283_v52 }
  0x47   :  { %109 = vadd.xlane.f32.xlu0 %v86_v48  ;;  %125 = vadd.xlane.f32.xlu1 %v94_v49 }
  0x48   :  { %347 = vmatpush1.msra.mxu0 %v282_v53  ;;  %1321 = vmatpush1.msra.mxu1 %v282_v53 }
  0x49   :  { %348 = vmatprep.subr.mxu0 %v279_v54  ;;  %1306 = vmatprep.subr.mxu1 %v279_v54 }
  0x4a   :  { %349 = vmatpush1.msra.mxu0 %v278_v55  ;;  %1322 = vmatpush1.msra.mxu1 %v278_v55  ;;  %v324_v55 = vld [vmem:[#allocation7 + $0x1f0] sm:$0xff] }
  0x4b   :  { %350 = vmatprep.subr.mxu0 %v275_v56  ;;  %1307 = vmatprep.subr.mxu1 %v275_v56 }
  0x4c   :  { %351 = vmatpush1.msra.mxu0 %v274_v57  ;;  %1323 = vmatpush1.msra.mxu1 %v274_v57 }
  0x4d   :  { %352 = vmatprep.subr.mxu0 %v271_v58  ;;  %1308 = vmatprep.subr.mxu1 %v271_v58  ;;  %v321_v58 = vld [vmem:[#allocation7 + $0x1d8] sm:$0xff] }
  0x4e   :  { %353 = vmatpush1.msra.mxu0 %v270_v59  ;;  %1324 = vmatpush1.msra.mxu1 %v270_v59 }
  0x4f   :  { %354 = vmatprep.subr.mxu0 %v267_v60  ;;  %1309 = vmatprep.subr.mxu1 %v267_v60 }
  0x50   :  { %355 = vmatpush1.msra.mxu0 %v266_v61  ;;  %390 = vmatprep.mubr.f32.mxu0 %v1605_v3 }
  0x51   :  { %356 = vmatprep.subr.mxu0 %v263_v62  ;;  %1325 = vmatpush1.msra.mxu1 %v266_v61 }
  0x52   :  { %357 = vmatpush1.msra.mxu0 %v262_v63  ;;  %1310 = vmatprep.subr.mxu1 %v263_v62 }
  0x53   :  { %1326 = vmatpush1.msra.mxu1 %v262_v63  ;;  %438 = vmatprep.mubr.f32.mxu1 %v1605_v3  ;;  %v317_v63 = vld [vmem:[#allocation7 + $0x1b8] sm:$0xff] }
  0x54   :  { %487 = vmatprep.subr.mxu1 %v325_v4 }
  0xb4   :  { %v96_v6 = vpop.xlane.xlu0 %95  ;;  %v98_v7 = vpop.xlane.xlu1 %97 }
  0xb5   :  { %1336 = vrsqrt.f32 %v96_v6 }
  0xb6   :  { %1338 = vrsqrt.f32 %v98_v7 }
  0xb8   :  { %v112_v10 = vpop.xlane.xlu0 %111  ;;  %v114_v11 = vpop.xlane.xlu1 %113 }
  0xb9   :  { %1340 = vrsqrt.f32 %v112_v10 }
  0xba   :  { %1342 = vrsqrt.f32 %v114_v11 }
  0xbc   :  { %v100_v12 = vpop.xlane.xlu0 %99  ;;  %v116_v13 = vpop.xlane.xlu1 %115 }
  0xbd   :  { %1344 = vrsqrt.f32 %v100_v12 }
  0xbe   :  { %1346 = vrsqrt.f32 %v116_v13  ;;  %v316_v13 = vld [vmem:[#allocation7 + $0x1b0] sm:$0xff] }
  0xc0   :  { %v102_v14 = vpop.xlane.xlu0 %101  ;;  %v118_v15 = vpop.xlane.xlu1 %117 }
  0xc1   :  { %1348 = vrsqrt.f32 %v102_v14 }
  0xc2   :  { %v1337_v18 = vpop.eup %1336  ;;  %1350 = vrsqrt.f32 %v118_v15 }
  0xc3   :  { %v1339_v19 = vpop.eup %1338  ;;  %v143_v20 = vmul.f32 11.313708, %v1337_v18  ;;  %v313_v18 = vld [vmem:[#allocation7 + $0x198] sm:$0xff] }
  0xc4   :  { %v144_v21 = vmul.f32 11.313708, %v1339_v19  ;;  %v104_v22 = vpop.xlane.xlu0 %103  ;;  %v120_v25 = vpop.xlane.xlu1 %119 }
  0xc5   :  { %v159_v26 = vmin.f32 %v143_v20, 1e+08  ;;  %1352 = vrsqrt.f32 %v104_v22  ;;  %v312_v20 = vld [vmem:[#allocation7 + $0x190] sm:$0xff] }
  0xc6   :  { %v1341_v27 = vpop.eup %1340  ;;  %v160_v28 = vmin.f32 %v144_v21, 1e+08  ;;  %1354 = vrsqrt.f32 %v120_v25 }
  0xc7   :  { %v1343_v32 = vpop.eup %1342  ;;  %v151_v33 = vmul.f32 11.313708, %v1341_v27  ;;  %v175_v34 = vmul.f32 %v159_v26, %v1647_v0  ;;  %v309_v26 = vld [vmem:[#allocation7 + $0x178] sm:$0xff] }
  0xc8   :  { %v152_v35 = vmul.f32 11.313708, %v1343_v32  ;;  %v106_v36 = vpop.xlane.xlu0 %105  ;;  %v122_v39 = vpop.xlane.xlu1 %121  ;;  %v176_v40 = vmul.f32 %v160_v28, %v1649_v1  ;;  %v308_v32 = vld [vmem:[#allocation7 + $0x170] sm:$0xff] }
  0xc9   :  { %v167_v41 = vmin.f32 %v151_v33, 1e+08  ;;  %1356 = vrsqrt.f32 %v106_v36  ;;  %v1721_v42 = vmul.f32 %v1716_v29, %v175_v34 }
  0xca   :  { %v1345_v43 = vpop.eup %1344  ;;  %v168_v46 = vmin.f32 %v152_v35, 1e+08  ;;  %1358 = vrsqrt.f32 %v122_v39  ;;  %v1725_v49 = vmul.f32 %v1716_v29, %v176_v40  ;;  %v305_v35 = vld [vmem:[#allocation7 + $0x158] sm:$0xff]  ;;  %v304_v39 = vld [vmem:[#allocation7 + $0x150] sm:$0xff] }
  0xcb   :  { %v1347_v47 = vpop.eup %1346  ;;  %v145_v48 = vmul.f32 11.313708, %v1345_v43  ;;  %391 = vmatmul.mubr.f32.vlgmr.msra.gmra.mxu0 %v1721_v42  ;;  %v183_v0 = vmul.f32 %v167_v41, %v1651_v2  ;;  %v320_v2 = vld [vmem:[#allocation7 + $0x1d0] sm:$0xff] }
  0xcc   :  { %v153_v50 = vmul.f32 11.313708, %v1347_v47  ;;  %v108_v51 = vpop.xlane.xlu0 %107  ;;  %396 = vmatprep.mubr.f32.mxu0 %v1605_v3  ;;  %v124_v1 = vpop.xlane.xlu1 %123  ;;  %v184_v52 = vmul.f32 %v168_v46, %v1657_v5  ;;  %v301_v46 = vld [vmem:[#allocation7 + $0x138] sm:$0xff] }
  0xcd   :  { %v161_v53 = vmin.f32 %v145_v48, 1e+08  ;;  %1360 = vrsqrt.f32 %v108_v51  ;;  %v1731_v54 = vmul.f32 %v1716_v29, %v183_v0  ;;  %v300_v0 = vld [vmem:[#allocation7 + $0x130] sm:$0xff] }
  0xce   :  { %v1349_v56 = vpop.eup %1348  ;;  %v169_v57 = vmin.f32 %v153_v50, 1e+08  ;;  %1362 = vrsqrt.f32 %v124_v1  ;;  %v1738_v4 = vmul.f32 %v1716_v29, %v184_v52 }
  0xcf   :  { %v1351_v59 = vpop.eup %1350  ;;  %v146_v60 = vmul.f32 11.313708, %v1349_v56  ;;  %397 = vmatmul.mubr.f32.gmra.mxu0 %v1725_v49  ;;  %439 = vmatmul.mubr.f32.vlgmr.msra.gmra.mxu1 %v1731_v54  ;;  %v177_v61 = vmul.f32 %v161_v53, %v1663_v8  ;;  %v296_v53 = vld [vmem:[#allocation7 + $0x110] sm:$0xff] }
  0xd0   :  { %v154_v5 = vmul.f32 11.313708, %v1351_v59  ;;  %488 = vmatpush1.msra.mxu1 %v324_v55  ;;  %v110_v62 = vpop.xlane.xlu0 %109  ;;  %402 = vmatprep.mubr.f32.mxu0 %v1605_v3  ;;  %v126_v6 = vpop.xlane.xlu1 %125  ;;  %v185_v7 = vmul.f32 %v169_v57, %v1665_v9 }
  0xd1   :  { %v162_v10 = vmin.f32 %v146_v60, 1e+08  ;;  %489 = vmatprep.subr.mxu1 %v321_v58  ;;  %1364 = vrsqrt.f32 %v110_v62  ;;  %444 = vmatprep.mubr.f32.mxu1 %v1605_v3  ;;  %v1743_v11 = vmul.f32 %v1716_v29, %v177_v61  ;;  %v293_v58 = vld [vmem:[#allocation7 + $0xf8] sm:$0xff] }
  0xd2   :  { %v1353_v8 = vpop.eup %1352  ;;  %v170_v12 = vmin.f32 %v154_v5, 1e+08  ;;  %490 = vmatpush1.msra.mxu1 %v320_v2  ;;  %1366 = vrsqrt.f32 %v126_v6  ;;  %v1750_v21 = vmul.f32 %v1716_v29, %v185_v7  ;;  %v292_v2 = vld [vmem:[#allocation7 + $0xf0] sm:$0xff] }
  0xd3   :  { %v1355_v14 = vpop.eup %1354  ;;  %v147_v15 = vmul.f32 11.313708, %v1353_v8  ;;  %491 = vmatprep.subr.mxu1 %v317_v63  ;;  %403 = vmatmul.mubr.f32.gmra.mxu0 %v1743_v11  ;;  %v178_v9 = vmul.f32 %v162_v10, %v1671_v16  ;;  %v288_v6 = vld [vmem:[#allocation7 + $0xd0] sm:$0xff] }
  0xd4   :  { %v155_v19 = vmul.f32 11.313708, %v1355_v14  ;;  %445 = vmatmul.mubr.f32.gmra.mxu1 %v1738_v4  ;;  %408 = vmatprep.mubr.f32.mxu0 %v1605_v3  ;;  %v186_v22 = vmul.f32 %v170_v12, %v1673_v17  ;;  %v285_v12 = vld [vmem:[#allocation7 + $0xb8] sm:$0xff] }
  0xd5   :  { %v163_v25 = vmin.f32 %v147_v15, 1e+08  ;;  %492 = vmatpush1.msra.mxu1 %v316_v13  ;;  %450 = vmatprep.mubr.f32.mxu1 %v1605_v3  ;;  %v1755_v27 = vmul.f32 %v1716_v29, %v178_v9 }
  0xd6   :  { %v1357_v16 = vpop.eup %1356  ;;  %v171_v28 = vmin.f32 %v155_v19, 1e+08  ;;  %493 = vmatprep.subr.mxu1 %v313_v18  ;;  %v1761_v40 = vmul.f32 %v1716_v29, %v186_v22  ;;  %v281_v18 = vld [vmem:[#allocation7 + $0x98] sm:$0xff] }
  0xd7   :  { %v1359_v33 = vpop.eup %1358  ;;  %v148_v34 = vmul.f32 11.313708, %v1357_v16  ;;  %494 = vmatpush1.msra.mxu1 %v312_v20  ;;  %409 = vmatmul.mubr.f32.gmra.mxu0 %v1755_v27  ;;  %v179_v17 = vmul.f32 %v163_v25, %v1679_v23  ;;  %v277_v20 = vld [vmem:[#allocation7 + $0x78] sm:$0xff]  ;;  %v272_v25 = vld [vmem:[#allocation7 + $0x50] sm:$0xff] }
  0xd8   :  { %v156_v36 = vmul.f32 11.313708, %v1359_v33  ;;  %495 = vmatprep.subr.mxu1 %v309_v26  ;;  %451 = vmatmul.mubr.f32.gmra.mxu1 %v1750_v21  ;;  %v187_v41 = vmul.f32 %v171_v28, %v1681_v24  ;;  %v297_v24 = vld [vmem:[#allocation7 + $0x118] sm:$0xff]  ;;  %v268_v28 = vld [vmem:[#allocation7 + $0x30] sm:$0xff] }
  0xd9   :  { %v164_v43 = vmin.f32 %v148_v34, 1e+08  ;;  %496 = vmatpush1.msra.mxu1 %v308_v32  ;;  %414 = vmatprep.mubr.f32.mxu0 %v1605_v3  ;;  %v1766_v47 = vmul.f32 %v1716_v29, %v179_v17  ;;  %v269_v16 = vld [vmem:[#allocation7 + $0x38] sm:$0xff]  ;;  %v264_v33 = vld [vmem:[#allocation7 + $0x10] sm:$0xff]  ;;  %v948_v34 = vld [vmem:[#allocation9 + $0xe0] sm:$0xff] }
  0xda   :  { %v1361_v48 = vpop.eup %1360  ;;  %v172_v23 = vmin.f32 %v156_v36, 1e+08  ;;  %497 = vmatprep.subr.mxu1 %v305_v35  ;;  %456 = vmatprep.mubr.f32.mxu1 %v1605_v3  ;;  %v1773_v55 = vmul.f32 %v1716_v29, %v187_v41  ;;  %v265_v32 = vld [vmem:[#allocation7 + $0x18] sm:$0xff]  ;;  %v946_v17 = vld [vmem:[#allocation9 + $0xd0] sm:$0xff]  ;;  %v944_v41 = vld [vmem:[#allocation9 + $0xc0] sm:$0xff] }
  0xdb   :  { %v1363_v50 = vpop.eup %1362  ;;  %v149_v51 = vmul.f32 11.313708, %v1361_v48  ;;  %498 = vmatpush1.msra.mxu1 %v304_v39  ;;  %415 = vmatmul.mubr.f32.gmra.mxu0 %v1766_v47  ;;  %v180_v1 = vmul.f32 %v164_v43, %v1687_v30  ;;  %v947_v35 = vld [vmem:[#allocation9 + $0xd8] sm:$0xff]  ;;  %v930_v36 = vld [vmem:[#allocation9 + $0x50] sm:$0xff]  ;;  %v945_v39 = vld [vmem:[#allocation9 + $0xc8] sm:$0xff] }
  0xdc   :  { %v157_v52 = vmul.f32 11.313708, %v1363_v50  ;;  %499 = vmatprep.subr.mxu1 %v301_v46  ;;  %457 = vmatmul.mubr.f32.gmra.mxu1 %v1761_v40  ;;  %v188_v56 = vmul.f32 %v172_v23, %v1689_v31  ;;  %v289_v31 = vld [vmem:[#allocation7 + $0xd8] sm:$0xff]  ;;  %v928_v43 = vld [vmem:[#allocation9 + $0x40] sm:$0xff]  ;;  %v926_v48 = vld [vmem:[#allocation9 + $0x30] sm:$0xff] }
  0xdd   :  { %v165_v57 = vmin.f32 %v149_v51, 1e+08  ;;  %500 = vmatpush1.msra.mxu1 %v300_v0  ;;  %420 = vmatprep.mubr.f32.mxu0 %v1605_v3  ;;  %v1778_v59 = vmul.f32 %v1716_v29, %v180_v1  ;;  %v943_v46 = vld [vmem:[#allocation9 + $0xb8] sm:$0xff]  ;;  %v941_v23 = vld [vmem:[#allocation9 + $0xa8] sm:$0xff]  ;;  %v940_v50 = vld [vmem:[#allocation9 + $0xa0] sm:$0xff] }
  0xde   :  { %v1365_v60 = vpop.eup %1364  ;;  %v173_v30 = vmin.f32 %v157_v52, 1e+08  ;;  %501 = vmatprep.subr.mxu1 %v297_v24  ;;  %462 = vmatprep.mubr.f32.mxu1 %v1605_v3  ;;  %v1785_v7 = vmul.f32 %v1716_v29, %v188_v56  ;;  %v925_v0 = vld [vmem:[#allocation9 + $0x28] sm:$0xff]  ;;  %v924_v51 = vld [vmem:[#allocation9 + $0x20] sm:$0xff]  ;;  %v939_v24 = vld [vmem:[#allocation9 + $0x98] sm:$0xff] }
  0xdf   :  { %v1367_v61 = vpop.eup %1366  ;;  %v150_v5 = vmul.f32 11.313708, %v1365_v60  ;;  %502 = vmatpush1.msra.mxu1 %v296_v53  ;;  %421 = vmatmul.mubr.f32.gmra.mxu0 %v1778_v59  ;;  %v181_v62 = vmul.f32 %v165_v57, %v1695_v37  ;;  %v284_v37 = vld [vmem:[#allocation7 + $0xb0] sm:$0xff]  ;;  %v923_v1 = vld [vmem:[#allocation9 + $0x18] sm:$0xff]  ;;  %v921_v56 = vld [vmem:[#allocation9 + $0x8] sm:$0xff] }
  0xe0   :  { %v158_v63 = vmul.f32 11.313708, %v1367_v61  ;;  %503 = vmatprep.subr.mxu1 %v293_v58  ;;  %463 = vmatmul.mubr.f32.gmra.mxu1 %v1773_v55  ;;  %v189_v10 = vmul.f32 %v173_v30, %v1697_v38  ;;  %v280_v38 = vld [vmem:[#allocation7 + $0x90] sm:$0xff]  ;;  %v936_v57 = vld [vmem:[#allocation9 + $0x80] sm:$0xff] }
  0xe1   :  { %v166_v8 = vmin.f32 %v150_v5, 1e+08  ;;  %504 = vmatpush1.msra.mxu1 %v292_v2  ;;  %426 = vmatprep.mubr.f32.mxu0 %v1605_v3  ;;  %v204_v13 = vmul.f32 %v1716_v29, %v181_v62  ;;  %v938_v52 = vld [vmem:[#allocation9 + $0x90] sm:$0xff]  ;;  %v920_v58 = vld [vmem:[#allocation9] sm:$0xff] }
  0xe2   :  { %v174_v14 = vmin.f32 %v158_v63, 1e+08  ;;  %505 = vmatprep.subr.mxu1 %v289_v31  ;;  %468 = vmatprep.mubr.f32.mxu1 %v1605_v3  ;;  %v1795_v19 = vmul.f32 %v1716_v29, %v189_v10  ;;  %v922_v53 = vld [vmem:[#allocation9 + $0x10] sm:$0xff] }
  0xe3   :  { %v182_v15 = vmul.f32 %v166_v8, %v1703_v44  ;;  %506 = vmatpush1.msra.mxu1 %v288_v6  ;;  %427 = vmatmul.mubr.f32.gmra.mxu0 %v204_v13  ;;  %v276_v44 = vld [vmem:[#allocation7 + $0x70] sm:$0xff] }
  0xe4   :  { %v190_v9 = vmul.f32 %v174_v14, %v1705_v45  ;;  %507 = vmatprep.subr.mxu1 %v285_v12  ;;  %469 = vmatmul.mubr.f32.gmra.mxu1 %v1785_v7  ;;  %v273_v45 = vld [vmem:[#allocation7 + $0x58] sm:$0xff] }
  0xe5   :  { %508 = vmatpush1.msra.mxu1 %v284_v37  ;;  %432 = vmatprep.mubr.f32.mxu0 %v1605_v3  ;;  %v205_v22 = vmul.f32 %v1716_v29, %v182_v15 }
  0xe6   :  { %509 = vmatprep.subr.mxu1 %v281_v18  ;;  %474 = vmatprep.mubr.f32.mxu1 %v1605_v3  ;;  %v213_v26 = vmul.f32 %v1716_v29, %v190_v9  ;;  %v951_v29 = vld [vmem:[#allocation9 + $0xf8] sm:$0xff] }
  0xe7   :  { %510 = vmatpush1.msra.mxu1 %v280_v38  ;;  %433 = vmatmul.mubr.f32.gmra.mxu0 %v205_v22 }
  0xe8   :  { %511 = vmatprep.subr.mxu1 %v277_v20  ;;  %475 = vmatmul.mubr.f32.gmra.mxu1 %v1795_v19 }
  0xe9   :  { %512 = vmatpush1.msra.mxu1 %v276_v44  ;;  %480 = vmatprep.mubr.f32.mxu1 %v1605_v3 }
  0xea   :  { %513 = vmatprep.subr.mxu1 %v273_v45  ;;  %1215 = vmatprep.subr.mxu0 %v951_v29 }
  0xeb   :  { %514 = vmatpush1.msra.mxu1 %v272_v25 }
  0xec   :  { %515 = vmatprep.subr.mxu1 %v269_v16  ;;  %481 = vmatmul.mubr.f32.gmra.mxu1 %v213_v26 }
  0xed   :  { %516 = vmatpush1.msra.mxu1 %v268_v28  ;;  %551 = vmatprep.mubr.f32.mxu1 %v1605_v3 }
  0xee   :  { %517 = vmatprep.subr.mxu1 %v265_v32 }
  0xef   :  { %518 = vmatpush1.msra.mxu1 %v264_v33 }
  0xf0   :  { %552 = vmatmul.mubr.f32.vlgmr.msra.gmra.mxu1 %v1721_v42  ;;  %v935_v42 = vld [vmem:[#allocation9 + $0x78] sm:$0xff] }
  0xf1   :  { %557 = vmatprep.mubr.f32.mxu1 %v1605_v3  ;;  %1216 = vmatpush3.msra.mxu0 %v935_v42 }
  0xf4   :  { %558 = vmatmul.mubr.f32.gmra.mxu1 %v1725_v49  ;;  %v950_v49 = vld [vmem:[#allocation9 + $0xf0] sm:$0xff] }
  0xf5   :  { %563 = vmatprep.mubr.f32.mxu1 %v1605_v3  ;;  %1217 = vmatprep.subr.mxu0 %v950_v49 }
  0xf8   :  { %564 = vmatmul.mubr.f32.gmra.mxu1 %v1743_v11  ;;  %v934_v11 = vld [vmem:[#allocation9 + $0x70] sm:$0xff] }
  0xf9   :  { %569 = vmatprep.mubr.f32.mxu1 %v1605_v3  ;;  %1218 = vmatpush3.msra.mxu0 %v934_v11 }
  0xfc   :  { %570 = vmatmul.mubr.f32.gmra.mxu1 %v1755_v27  ;;  %v949_v27 = vld [vmem:[#allocation9 + $0xe8] sm:$0xff] }
  0xfd   :  { %575 = vmatprep.mubr.f32.mxu1 %v1605_v3  ;;  %1219 = vmatprep.subr.mxu0 %v949_v27 }
 0x100   :  { %576 = vmatmul.mubr.f32.gmra.mxu1 %v1766_v47  ;;  %v927_v47 = vld [vmem:[#allocation9 + $0x38] sm:$0xff] }
 0x101   :  { %581 = vmatprep.mubr.f32.mxu1 %v1605_v3 }
 0x104   :  { %582 = vmatmul.mubr.f32.gmra.mxu1 %v1778_v59 }
 0x105   :  { %587 = vmatprep.mubr.f32.mxu1 %v1605_v3 }
 0x108   :  { %588 = vmatmul.mubr.f32.gmra.mxu1 %v204_v13 }
 0x109   :  { %593 = vmatprep.mubr.f32.mxu1 %v1605_v3 }
 0x10c   :  { %594 = vmatmul.mubr.f32.gmra.mxu1 %v205_v22 }
 0x10d   :  { %599 = vmatprep.mubr.f32.mxu1 %v1605_v3 }
 0x110   :  { %600 = vmatmul.mubr.f32.gmra.mxu1 %v1731_v54  ;;  %v933_v54 = vld [vmem:[#allocation9 + $0x68] sm:$0xff] }
 0x111   :  { %605 = vmatprep.mubr.f32.mxu1 %v1605_v3  ;;  %1220 = vmatpush3.msra.mxu0 %v933_v54 }
 0x112   :  { %1221 = vmatprep.subr.mxu0 %v948_v34 }
 0x114   :  { %606 = vmatmul.mubr.f32.gmra.mxu1 %v1738_v4  ;;  %v932_v4 = vld [vmem:[#allocation9 + $0x60] sm:$0xff] }
 0x115   :  { %611 = vmatprep.mubr.f32.mxu1 %v1605_v3  ;;  %1222 = vmatpush3.msra.mxu0 %v932_v4 }
 0x116   :  { %1223 = vmatprep.subr.mxu0 %v947_v35 }
 0x118   :  { %612 = vmatmul.mubr.f32.gmra.mxu1 %v1750_v21  ;;  %v931_v21 = vld [vmem:[#allocation9 + $0x58] sm:$0xff] }
 0x119   :  { %617 = vmatprep.mubr.f32.mxu1 %v1605_v3  ;;  %1224 = vmatpush3.msra.mxu0 %v931_v21 }
 0x11a   :  { %1225 = vmatprep.subr.mxu0 %v946_v17 }
 0x11b   :  { %1226 = vmatpush3.msra.mxu0 %v930_v36 }
 0x11c   :  { %618 = vmatmul.mubr.f32.gmra.mxu1 %v1761_v40  ;;  %1227 = vmatprep.subr.mxu0 %v945_v39  ;;  %v929_v40 = vld [vmem:[#allocation9 + $0x48] sm:$0xff] }
 0x11d   :  { %623 = vmatprep.mubr.f32.mxu1 %v1605_v3  ;;  %1228 = vmatpush3.msra.mxu0 %v929_v40 }
 0x11e   :  { %1229 = vmatprep.subr.mxu0 %v944_v41 }
 0x11f   :  { %1230 = vmatpush3.msra.mxu0 %v928_v43 }
 0x120   :  { %624 = vmatmul.mubr.f32.gmra.mxu1 %v1773_v55  ;;  %1231 = vmatprep.subr.mxu0 %v943_v46  ;;  %v937_v55 = vld [vmem:[#allocation9 + $0x88] sm:$0xff] }
 0x121   :  { %629 = vmatprep.mubr.f32.mxu1 %v1605_v3  ;;  %1232 = vmatpush3.msra.mxu0 %v927_v47 }
 0x124   :  { %630 = vmatmul.mubr.f32.gmra.mxu1 %v1785_v7 }
 0x125   :  { %635 = vmatprep.mubr.f32.mxu1 %v1605_v3 }
 0x128   :  { %636 = vmatmul.mubr.f32.gmra.mxu1 %v1795_v19 }
 0x129   :  { %641 = vmatprep.mubr.f32.mxu1 %v1605_v3  ;;  %v942_v3 = vld [vmem:[#allocation9 + $0xb0] sm:$0xff] }
 0x12a   :  { %1233 = vmatprep.subr.mxu0 %v942_v3 }
 0x12b   :  { %1234 = vmatpush3.msra.mxu0 %v926_v48 }
 0x12c   :  { %642 = vmatmul.mubr.f32.gmra.mxu1 %v213_v26  ;;  %1235 = vmatprep.subr.mxu0 %v941_v23 }
 0x12d   :  { %1236 = vmatpush3.msra.mxu0 %v925_v0 }
 0x12e   :  { %1237 = vmatprep.subr.mxu0 %v940_v50 }
 0x12f   :  { %1238 = vmatpush3.msra.mxu0 %v924_v51 }
 0x130   :  { %1239 = vmatprep.subr.mxu0 %v939_v24 }
 0x131   :  { %1240 = vmatpush3.msra.mxu0 %v923_v1 }
 0x132   :  { %1241 = vmatprep.subr.mxu0 %v938_v52 }
 0x133   :  { %1242 = vmatpush3.msra.mxu0 %v922_v53 }
 0x134   :  { %1243 = vmatprep.subr.mxu0 %v937_v55 }
 0x135   :  { %1244 = vmatpush3.msra.mxu0 %v921_v56 }
 0x136   :  { %1245 = vmatprep.subr.mxu0 %v936_v57 }
 0x137   :  { %1246 = vmatpush3.msra.mxu0 %v920_v58 }
 0x18b   :  { %v1832_v59 = vpop.f32.mrf.mxu0 }
 0x18c   :  { %v1183_v60 = vmul.f32 -1.442695, %v1832_v59 }
 0x18d   :  { %v1835_v30 = vpop.f32.mrf.mxu0 }
 0x18e   :  { %1368 = vpow2.f32 %v1183_v60  ;;  %v1184_v2 = vmul.f32 -1.442695, %v1835_v30 }
 0x18f   :  { %v1838_v61 = vpop.f32.mrf.mxu0  ;;  %v1840_v5 = vpop.f32.mrf.mxu1 }
 0x190   :  { %1370 = vpow2.f32 %v1184_v2  ;;  %v1185_v31 = vmul.f32 -1.442695, %v1838_v61  ;;  %v1199_v41 = vmul.f32 -1.442695, %v1840_v5 }
 0x191   :  { %v1843_v62 = vpop.f32.mrf.mxu0  ;;  %v1845_v63 = vpop.f32.mrf.mxu1 }
 0x192   :  { %1372 = vpow2.f32 %v1185_v31  ;;  %v1186_v6 = vmul.f32 -1.442695, %v1843_v62  ;;  %v1200_v51 = vmul.f32 -1.442695, %v1845_v63 }
 0x193   :  { %v1848_v7 = vpop.f32.mrf.mxu0 }
 0x194   :  { %1374 = vpow2.f32 %v1186_v6  ;;  %v1187_v10 = vmul.f32 -1.442695, %v1848_v7  ;;  %v1851_v8 = vpop.f32.mrf.mxu1 }
 0x195   :  { %v1853_v12 = vpop.f32.mrf.mxu0 }
 0x196   :  { %1376 = vpow2.f32 %v1187_v10  ;;  %v1188_v13 = vmul.f32 -1.442695, %v1853_v12  ;;  %v1856_v14 = vpop.f32.mrf.mxu1 }
 0x197   :  { %v1858_v37 = vpop.f32.mrf.mxu0 }
 0x198   :  { %1378 = vpow2.f32 %v1188_v13  ;;  %v1189_v15 = vmul.f32 -1.442695, %v1858_v37  ;;  %v1861_v18 = vpop.f32.mrf.mxu1 }
 0x199   :  { %v1863_v9 = vpop.f32.mrf.mxu0 }
 0x19a   :  { %1380 = vpow2.f32 %v1189_v15  ;;  %v1190_v38 = vmul.f32 -1.442695, %v1863_v9  ;;  %v1866_v19 = vpop.f32.mrf.mxu1  ;;  %v1201_v15 = vmul.f32 -1.442695, %v1851_v8 }
 0x19b   :  { %v1369_v20 = vpop.eup %1368  ;;  %v1868_v22 = vpop.f32.mrf.mxu0 }
 0x19c   :  { %1382 = vpow2.f32 %v1190_v38  ;;  %v1870_v44 = vpop.f32.mrf.mxu1  ;;  %v744_v26 = vadd.f32 1.0, %v1369_v20  ;;  %v1191_v34 = vmul.f32 -1.442695, %v1868_v22 }
 0x19d   :  { %v1371_v45 = vpop.eup %1370  ;;  %v1872_v25 = vpop.f32.mrf.mxu0 }
 0x19e   :  { %v745_v16 = vadd.f32 1.0, %v1371_v45  ;;  %v1874_v28 = vpop.f32.mrf.mxu1  ;;  %v1192_v23 = vmul.f32 -1.442695, %v1872_v25 }
 0x19f   :  { %v1373_v32 = vpop.eup %1372  ;;  %v1878_v42 = vpop.f32.mrf.mxu0 }
 0x1a0   :  { %v1876_v33 = vpop.f32.mrf.mxu1  ;;  %1384 = vrcp.f32 %v745_v16  ;;  %v746_v49 = vadd.f32 1.0, %v1373_v32  ;;  %v1193_v52 = vmul.f32 -1.442695, %v1878_v42  ;;  %v1202_v32 = vmul.f32 -1.442695, %v1856_v14 }
 0x1a1   :  { %v1375_v29 = vpop.eup %1374  ;;  %1386 = vrcp.f32 %v744_v26  ;;  %v1885_v21 = vpop.f32.mrf.mxu0 }
 0x1a2   :  { %v747_v11 = vadd.f32 1.0, %v1375_v29  ;;  %v1880_v27 = vpop.f32.mrf.mxu1  ;;  %v1194_v56 = vmul.f32 -1.442695, %v1885_v21 }
 0x1a3   :  { %v1377_v54 = vpop.eup %1376  ;;  %v1892_v3 = vpop.f32.mrf.mxu0 }
 0x1a4   :  { %v1883_v4 = vpop.f32.mrf.mxu1  ;;  %1388 = vrcp.f32 %v747_v11  ;;  %v748_v17 = vadd.f32 1.0, %v1377_v54  ;;  %v1195_v6 = vmul.f32 -1.442695, %v1892_v3 }
 0x1a5   :  { %v1379_v35 = vpop.eup %1378  ;;  %1390 = vrcp.f32 %v746_v49  ;;  %v1900_v24 = vpop.f32.mrf.mxu0 }
 0x1a6   :  { %v749_v36 = vadd.f32 1.0, %v1379_v35  ;;  %v1887_v39 = vpop.f32.mrf.mxu1  ;;  %1392 = vpow2.f32 %v1191_v34  ;;  %v1196_v20 = vmul.f32 -1.442695, %v1900_v24  ;;  %v1204_v35 = vmul.f32 -1.442695, %v1866_v19 }
 0x1a7   :  { %v1381_v40 = vpop.eup %1380  ;;  %v1907_v60 = vpop.f32.mrf.mxu0 }
 0x1a8   :  { %v750_v43 = vadd.f32 1.0, %v1381_v40  ;;  %v1890_v46 = vpop.f32.mrf.mxu1  ;;  %1394 = vrcp.f32 %v749_v36  ;;  %v1197_v11 = vmul.f32 -1.442695, %v1907_v60 }
 0x1a9   :  { %v1383_v47 = vpop.eup %1382  ;;  %1396 = vrcp.f32 %v748_v17  ;;  %v1915_v29 = vpop.f32.mrf.mxu0 }
 0x1aa   :  { %v751_v48 = vadd.f32 1.0, %v1383_v47  ;;  %v1895_v0 = vpop.f32.mrf.mxu1  ;;  %1398 = vpow2.f32 %v1199_v41 }
 0x1ab   :  { %1400 = vrcp.f32 %v750_v43 }
 0x1ac   :  { %v1897_v50 = vpop.f32.mrf.mxu1  ;;  %1402 = vrcp.f32 %v751_v48 }
 0x1ad   :  { %v1385_v1 = vpop.eup %1384  ;;  %1404 = vpow2.f32 %v1192_v23 }
 0x1ae   :  { %v1903_v53 = vpop.f32.mrf.mxu1  ;;  %v1387_v55 = vpop.eup %1386  ;;  %v841_v58 = vmul.f32 %v1385_v1, %v1835_v30  ;;  %1406 = vpow2.f32 %v1200_v51 }
 0x1af   :  { %v840_v31 = vmul.f32 %v1387_v55, %v1832_v59  ;;  %1408 = vpow2.f32 %v1193_v52  ;;  %v1203_v52 = vmul.f32 -1.442695, %v1861_v18 }
 0x1b0   :  { %v553_v57 = vpop.f32.mrf.mxu1  ;;  %1410 = vpow2.f32 %v1194_v56  ;;  %v1205_v56 = vmul.f32 -1.442695, %v1870_v44 }
 0x1b1   :  { %v1389_v2 = vpop.eup %1388  ;;  %v872_v45 = vmul.f32 %v840_v31, %v553_v57  ;;  %1412 = vpow2.f32 %v1195_v6 }
 0x1b2   :  { %v555_v10 = vpop.f32.mrf.mxu1  ;;  %v1391_v13 = vpop.eup %1390  ;;  %v843_v16 = vmul.f32 %v1389_v2, %v1843_v62  ;;  %1414 = vpow2.f32 %v1201_v15  ;;  %v1198_v62 = vmul.f32 -1.442695, %v1915_v29 }
 0x1b3   :  { %v873_v38 = vmul.f32 %v841_v58, %v555_v10  ;;  %v1393_v30 = vpop.eup %1392  ;;  %v842_v49 = vmul.f32 %v1391_v13, %v1838_v61  ;;  %1416 = vpow2.f32 %v1196_v20  ;;  %v1206_v10 = vmul.f32 -1.442695, %v1874_v28 }
 0x1b4   :  { %v559_v26 = vpop.f32.mrf.mxu1  ;;  %1418 = vpow2.f32 %v1202_v32  ;;  %v752_v61 = vadd.f32 1.0, %v1393_v30 }
 0x1b5   :  { %1016 = vmatprep.mubr.f32.mxu0 %v873_v38  ;;  %v1395_v59 = vpop.eup %1394  ;;  %v874_v40 = vmul.f32 %v842_v49, %v559_v26  ;;  %1420 = vpow2.f32 %v1197_v11 }
 0x1b6   :  { %v561_v54 = vpop.f32.mrf.mxu1  ;;  %1017 = vmatmul.mubr.f32.vlgmr.msra.gmra.mxu0 %v872_v45  ;;  %v1397_v34 = vpop.eup %1396  ;;  %v845_v47 = vmul.f32 %v1395_v59, %v1853_v12  ;;  %1422 = vpow2.f32 %v1204_v35  ;;  %v1207_v35 = vmul.f32 -1.442695, %v1876_v33 }
 0x1b7   :  { %v875_v17 = vmul.f32 %v843_v16, %v561_v54  ;;  %v1399_v36 = vpop.eup %1398  ;;  %v844_v23 = vmul.f32 %v1397_v34, %v1848_v7  ;;  %1424 = vpow2.f32 %v1198_v62  ;;  %v1210_v62 = vmul.f32 -1.442695, %v1887_v39 }
 0x1b8   :  { %v565_v41 = vpop.f32.mrf.mxu1  ;;  %v1401_v43 = vpop.eup %1400  ;;  %v760_v2 = vadd.f32 1.0, %v1399_v36  ;;  %1426 = vrcp.f32 %v752_v61 }
 0x1b9   :  { %1021 = vmatprep.mubr.f32.mxu0 %v875_v17  ;;  %v1403_v48 = vpop.eup %1402  ;;  %v876_v58 = vmul.f32 %v844_v23, %v565_v41  ;;  %v846_v6 = vmul.f32 %v1401_v43, %v1858_v37  ;;  %v1208_v37 = vmul.f32 -1.442695, %v1880_v27 }
 0x1ba   :  { %v567_v51 = vpop.f32.mrf.mxu1  ;;  %1022 = vmatmul.mubr.f32.gmra.mxu0 %v874_v40  ;;  %v1405_v1 = vpop.eup %1404  ;;  %v847_v31 = vmul.f32 %v1403_v48, %v1863_v9 }
 0x1bb   :  { %v877_v55 = vmul.f32 %v845_v47, %v567_v51  ;;  %v753_v57 = vadd.f32 1.0, %v1405_v1  ;;  %v1407_v7 = vpop.eup %1406 }
 0x1bc   :  { %v571_v12 = vpop.f32.mrf.mxu1  ;;  %v1409_v15 = vpop.eup %1408  ;;  %v761_v9 = vadd.f32 1.0, %v1407_v7 }
 0x1bd   :  { %1026 = vmatprep.mubr.f32.mxu0 %v877_v55  ;;  %1428 = vrcp.f32 %v753_v57  ;;  %v754_v20 = vadd.f32 1.0, %v1409_v15  ;;  %v878_v45 = vmul.f32 %v846_v6, %v571_v12  ;;  %v1411_v30 = vpop.eup %1410  ;;  %v1209_v57 = vmul.f32 -1.442695, %v1883_v4 }
 0x1be   :  { %v573_v13 = vpop.f32.mrf.mxu1  ;;  %1027 = vmatmul.mubr.f32.gmra.mxu0 %v876_v58  ;;  %1430 = vpow2.f32 %v1203_v52  ;;  %v755_v16 = vadd.f32 1.0, %v1411_v30  ;;  %v1413_v59 = vpop.eup %1412  ;;  %v1212_v52 = vmul.f32 -1.442695, %v1895_v0  ;;  %v1214_v15 = vmul.f32 -1.442695, %v1903_v53 }
 0x1bf   :  { %v879_v38 = vmul.f32 %v847_v31, %v573_v13  ;;  %1432 = vpow2.f32 %v1205_v56  ;;  %v1415_v49 = vpop.eup %1414  ;;  %v756_v11 = vadd.f32 1.0, %v1413_v59  ;;  %v1211_v30 = vmul.f32 -1.442695, %v1890_v46 }
 0x1c0   :  { %v577_v26 = vpop.f32.mrf.mxu1  ;;  %1434 = vrcp.f32 %v760_v2  ;;  %v1417_v34 = vpop.eup %1416  ;;  %v762_v12 = vadd.f32 1.0, %v1415_v49 }
 0x1c1   :  { %1031 = vmatprep.mubr.f32.mxu0 %v879_v38  ;;  %1436 = vpow2.f32 %v1206_v10  ;;  %v1419_v17 = vpop.eup %1418  ;;  %v757_v36 = vadd.f32 1.0, %v1417_v34 }
 0x1c2   :  { %v579_v32 = vpop.f32.mrf.mxu1  ;;  %1032 = vmatmul.mubr.f32.gmra.mxu0 %v878_v45  ;;  %1438 = vrcp.f32 %v754_v20  ;;  %v1421_v41 = vpop.eup %1420  ;;  %v763_v23 = vadd.f32 1.0, %v1419_v17 }
 0x1c3   :  { %1440 = vrcp.f32 %v755_v16  ;;  %v1423_v43 = vpop.eup %1422  ;;  %v758_v47 = vadd.f32 1.0, %v1421_v41 }
 0x1c4   :  { %v1929_v54 = vpop.f32.mrf.mxu1  ;;  %1442 = vrcp.f32 %v761_v9  ;;  %v1425_v48 = vpop.eup %1424  ;;  %v765_v6 = vadd.f32 1.0, %v1423_v43 }
 0x1c5   :  { %1444 = vpow2.f32 %v1208_v37  ;;  %v1427_v51 = vpop.eup %1426  ;;  %v759_v1 = vadd.f32 1.0, %v1425_v48 }
 0x1c6   :  { %v585_v40 = vpop.f32.mrf.mxu1  ;;  %1446 = vrcp.f32 %v756_v11  ;;  %v848_v10 = vmul.f32 %v1427_v51, %v1868_v22 }
 0x1c7   :  { %1448 = vrcp.f32 %v757_v36 }
 0x1c8   :  { %v1933_v61 = vpop.f32.mrf.mxu1  ;;  %1450 = vpow2.f32 %v1207_v35 }
 0x1c9   :  { %1452 = vpow2.f32 %v1210_v62 }
 0x1ca   :  { %v591_v55 = vpop.f32.mrf.mxu1  ;;  %v1429_v56 = vpop.eup %1428  ;;  %1454 = vrcp.f32 %v758_v47 }
 0x1cb   :  { %v1431_v58 = vpop.eup %1430  ;;  %v849_v2 = vmul.f32 %v1429_v56, %v1872_v25  ;;  %1456 = vrcp.f32 %v759_v1  ;;  %v880_v25 = vmul.f32 %v848_v10, %v577_v26  ;;  %v1213_v26 = vmul.f32 -1.442695, %v1897_v50 }
 0x1cc   :  { %v1938_v31 = vpop.f32.mrf.mxu1  ;;  %v1433_v7 = vpop.eup %1432  ;;  %1458 = vrcp.f32 %v763_v23  ;;  %v764_v59 = vadd.f32 1.0, %v1431_v58 }
 0x1cd   :  { %v1941_v13 = vpop.eup %1434  ;;  %1460 = vpow2.f32 %v1212_v52  ;;  %v881_v38 = vmul.f32 %v849_v2, %v579_v32 }
 0x1ce   :  { %v597_v20 = vpop.f32.mrf.mxu1  ;;  %v1437_v45 = vpop.eup %1436  ;;  %1462 = vpow2.f32 %v1209_v57 }
 0x1cf   :  { %v1439_v9 = vpop.eup %1438  ;;  %1464 = vrcp.f32 %v762_v12  ;;  %1036 = vmatprep.mubr.f32.mxu0 %v881_v38  ;;  %v767_v49 = vadd.f32 1.0, %v1437_v45 }
 0x1d0   :  { %v1945_v16 = vpop.f32.mrf.mxu1  ;;  %v1441_v37 = vpop.eup %1440  ;;  %1466 = vrcp.f32 %v765_v6  ;;  %1037 = vmatmul.mubr.f32.gmra.mxu0 %v880_v25  ;;  %v850_v35 = vmul.f32 %v1439_v9, %v1878_v42  ;;  %v766_v42 = vadd.f32 1.0, %v1433_v7 }
 0x1d1   :  { %v1443_v22 = vpop.eup %1442  ;;  %v851_v11 = vmul.f32 %v1441_v37, %v1885_v21  ;;  %1468 = vpow2.f32 %v1214_v15 }
 0x1d2   :  { %v603_v32 = vpop.f32.mrf.mxu1  ;;  %v1445_v34 = vpop.eup %1444  ;;  %1470 = vpow2.f32 %v1211_v30  ;;  %v882_v43 = vmul.f32 %v850_v35, %v1929_v54  ;;  %v857_v12 = vmul.f32 %v1443_v22, %v1845_v63 }
 0x1d3   :  { %v1447_v17 = vpop.eup %1446  ;;  %v883_v36 = vmul.f32 %v851_v11, %v585_v40  ;;  %1472 = vrcp.f32 %v764_v59  ;;  %v769_v48 = vadd.f32 1.0, %v1445_v34  ;;  %v856_v59 = vmul.f32 %v1941_v13, %v1840_v5 }
 0x1d4   :  { %v1950_v62 = vpop.f32.mrf.mxu1  ;;  %v1449_v41 = vpop.eup %1448  ;;  %1474 = vrcp.f32 %v767_v49  ;;  %v852_v1 = vmul.f32 %v1447_v17, %v1892_v3  ;;  %v889_v38 = vmul.f32 %v857_v12, %v603_v32 }
 0x1d5   :  { %v1451_v47 = vpop.eup %1450  ;;  %v853_v21 = vmul.f32 %v1449_v41, %v1900_v24  ;;  %1041 = vmatprep.mubr.f32.mxu0 %v883_v36  ;;  %1476 = vpow2.f32 %v1213_v26 }
 0x1d6   :  { %v609_v23 = vpop.f32.mrf.mxu1  ;;  %v1453_v51 = vpop.eup %1452  ;;  %1042 = vmatmul.mubr.f32.gmra.mxu0 %v882_v43  ;;  %v884_v54 = vmul.f32 %v852_v1, %v1933_v61  ;;  %1478 = vrcp.f32 %v769_v48  ;;  %v768_v3 = vadd.f32 1.0, %v1451_v47 }
 0x1d7   :  { %v1455_v40 = vpop.eup %1454  ;;  %v885_v52 = vmul.f32 %v853_v21, %v591_v55  ;;  %v771_v24 = vadd.f32 1.0, %v1453_v51  ;;  %1480 = vrcp.f32 %v766_v42 }
 0x1d8   :  { %v1955_v56 = vpop.f32.mrf.mxu1  ;;  %v1457_v57 = vpop.eup %1456  ;;  %v854_v10 = vmul.f32 %v1455_v40, %v1907_v60 }
 0x1d9   :  { %v1459_v58 = vpop.eup %1458  ;;  %v855_v2 = vmul.f32 %v1457_v57, %v1915_v29  ;;  %1046 = vmatprep.mubr.f32.mxu0 %v885_v52  ;;  %1482 = vrcp.f32 %v771_v24 }
 0x1da   :  { %v615_v7 = vpop.f32.mrf.mxu1  ;;  %v1461_v6 = vpop.eup %1460  ;;  %1047 = vmatmul.mubr.f32.gmra.mxu0 %v884_v54  ;;  %v886_v30 = vmul.f32 %v854_v10, %v1938_v31  ;;  %v859_v25 = vmul.f32 %v1459_v58, %v1856_v14  ;;  %1484 = vrcp.f32 %v768_v3  ;;  %v888_v31 = vmul.f32 %v856_v59, %v1945_v16  ;;  %v1497_v59 = vld [vmem:[#allocation4 + $0x8] sm:$0xff] }
 0x1db   :  { %v1463_v55 = vpop.eup %1462  ;;  %v887_v15 = vmul.f32 %v855_v2, %v597_v20  ;;  %v773_v29 = vadd.f32 1.0, %v1461_v6 }
 0x1dc   :  { %v619_v45 = vpop.f32.mrf.mxu1  ;;  %v1465_v61 = vpop.eup %1464  ;;  %v770_v60 = vadd.f32 1.0, %v1463_v55  ;;  %v891_v22 = vmul.f32 %v859_v25, %v609_v23 }
 0x1dd   :  { %v1467_v63 = vpop.eup %1466  ;;  %1051 = vmatprep.mubr.f32.mxu0 %v887_v15  ;;  %1486 = vrcp.f32 %v773_v29  ;;  %v858_v26 = vmul.f32 %v1465_v61, %v1851_v8  ;;  %v1496_v29 = vld [vmem:[#allocation4] sm:$0xff] }
 0x1de   :  { %v621_v9 = vpop.f32.mrf.mxu1  ;;  %v1469_v37 = vpop.eup %1468  ;;  %1052 = vmatmul.mubr.f32.gmra.mxu0 %v886_v30  ;;  %v861_v14 = vmul.f32 %v1467_v63, %v1866_v19  ;;  %1488 = vrcp.f32 %v770_v60 }
 0x1df   :  { %v1471_v20 = vpop.eup %1470  ;;  %1056 = vmatprep.mubr.f32.mxu0 %v889_v38  ;;  %v775_v32 = vadd.f32 1.0, %v1469_v37  ;;  %v890_v41 = vmul.f32 %v858_v26, %v1950_v62 }
 0x1e0   :  { %v625_v49 = vpop.f32.mrf.mxu1  ;;  %v1473_v11 = vpop.eup %1472  ;;  %v772_v5 = vadd.f32 1.0, %v1471_v20  ;;  %v893_v17 = vmul.f32 %v861_v14, %v615_v7 }
 0x1e1   :  { %v1475_v35 = vpop.eup %1474  ;;  %1490 = vrcp.f32 %v775_v32  ;;  %v860_v47 = vmul.f32 %v1473_v11, %v1861_v18  ;;  %v1499_v32 = vld [vmem:[#allocation4 + $0x18] sm:$0xff] }
 0x1e2   :  { %v627_v34 = vpop.f32.mrf.mxu1  ;;  %1057 = vmatmul.mubr.f32.gmra.mxu0 %v888_v31  ;;  %v1477_v13 = vpop.eup %1476  ;;  %v863_v16 = vmul.f32 %v1475_v35, %v1874_v28  ;;  %1492 = vrcp.f32 %v772_v5 }
 0x1e3   :  { %1061 = vmatprep.mubr.f32.mxu0 %v891_v22  ;;  %v1479_v19 = vpop.eup %1478  ;;  %v774_v48 = vadd.f32 1.0, %v1477_v13  ;;  %v892_v23 = vmul.f32 %v860_v47, %v1955_v56  ;;  %v1500_v13 = vld [vmem:[#allocation4 + $0x20] sm:$0xff] }
 0x1e4   :  { %v631_v36 = vpop.f32.mrf.mxu1  ;;  %v1481_v8 = vpop.eup %1480  ;;  %v895_v21 = vmul.f32 %v863_v16, %v621_v9  ;;  %v865_v42 = vmul.f32 %v1479_v19, %v1880_v27  ;;  %v1501_v19 = vld [vmem:[#allocation4 + $0x28] sm:$0xff] }
 0x1e5   :  { %v862_v62 = vmul.f32 %v1481_v8, %v1870_v44  ;;  %1494 = vrcp.f32 %v774_v48 }
 0x1e6   :  { %v633_v43 = vpop.f32.mrf.mxu1  ;;  %1062 = vmatmul.mubr.f32.gmra.mxu0 %v890_v41  ;;  %v1483_v1 = vpop.eup %1482  ;;  %v897_v40 = vmul.f32 %v865_v42, %v627_v34 }
 0x1e7   :  { %1066 = vmatprep.mubr.f32.mxu0 %v893_v17  ;;  %v1485_v28 = vpop.eup %1484  ;;  %v894_v18 = vmul.f32 %v862_v62, %v619_v45  ;;  %v867_v57 = vmul.f32 %v1483_v1, %v1887_v39 }
 0x1e8   :  { %v637_v51 = vpop.f32.mrf.mxu1  ;;  %v864_v58 = vmul.f32 %v1485_v28, %v1876_v33  ;;  %v1503_v28 = vld [vmem:[#allocation4 + $0x38] sm:$0xff] }
 0x1e9   :  { %v899_v12 = vmul.f32 %v867_v57, %v633_v43 }
 0x1ea   :  { %1067 = vmatmul.mubr.f32.gmra.mxu0 %v892_v23  ;;  %v639_v52 = vpop.f32.mrf.mxu1  ;;  %v1487_v54 = vpop.eup %1486  ;;  %v896_v27 = vmul.f32 %v864_v58, %v625_v49  ;;  %v1498_v49 = vld [vmem:[#allocation4 + $0x10] sm:$0xff] }
 0x1eb   :  { %1071 = vmatprep.mubr.f32.mxu0 %v895_v21  ;;  %v1489_v56 = vpop.eup %1488  ;;  %v869_v44 = vmul.f32 %v1487_v54, %v1895_v0  ;;  %v1502_v23 = vld [vmem:[#allocation4 + $0x30] sm:$0xff]  ;;  %v1504_v54 = vld [vmem:[#allocation4 + $0x40] sm:$0xff] }
 0x1ec   :  { %v643_v24 = vpop.f32.mrf.mxu1  ;;  %v866_v7 = vmul.f32 %v1489_v56, %v1883_v4 }
 0x1ed   :  { %v901_v3 = vmul.f32 %v869_v44, %v639_v52 }
 0x1ee   :  { %1072 = vmatmul.mubr.f32.gmra.mxu0 %v894_v18  ;;  %v1491_v2 = vpop.eup %1490  ;;  %v898_v10 = vmul.f32 %v866_v7, %v631_v36  ;;  %v645_v39 = vpop.f32.mrf.mxu1 }
 0x1ef   :  { %1076 = vmatprep.mubr.f32.mxu0 %v897_v40  ;;  %v1493_v6 = vpop.eup %1492  ;;  %v871_v55 = vmul.f32 %v1491_v2, %v1903_v53 }
 0x1f0   :  { %v868_v33 = vmul.f32 %v1493_v6, %v1890_v46 }
 0x1f1   :  { %v903_v38 = vmul.f32 %v871_v55, %v645_v39 }
 0x1f2   :  { %1077 = vmatmul.mubr.f32.gmra.mxu0 %v896_v27  ;;  %v1495_v15 = vpop.eup %1494  ;;  %v900_v45 = vmul.f32 %v868_v33, %v637_v51 }
 0x1f3   :  { %1081 = vmatprep.mubr.f32.mxu0 %v899_v12  ;;  %v870_v0 = vmul.f32 %v1495_v15, %v1897_v50  ;;  %v1507_v15 = vld [vmem:[#allocation4 + $0x58] sm:$0xff] }
 0x1f5   :  { %v902_v4 = vmul.f32 %v870_v0, %v643_v24  ;;  %v1505_v24 = vld [vmem:[#allocation4 + $0x48] sm:$0xff] }
 0x1f6   :  { %1082 = vmatmul.mubr.f32.gmra.mxu0 %v898_v10 }
 0x1f7   :  { %1086 = vmatprep.mubr.f32.mxu0 %v901_v3  ;;  %v1506_v3 = vld [vmem:[#allocation4 + $0x50] sm:$0xff] }
 0x1fa   :  { %1087 = vmatmul.mubr.f32.gmra.mxu0 %v900_v45 }
 0x1fb   :  { %1091 = vmatprep.mubr.f32.mxu0 %v903_v38 }
 0x1fe   :  { %1092 = vmatmul.mubr.f32.gmra.mxu0 %v902_v4 }
 0x276   :  { %v1247_v61 = vpop.f32.mrf.mxu0 }
 0x278   :  { %v1248_v30 = vpop.f32.mrf.mxu0 }
 0x279   :  { %v1249_v63 = vadd.f32 %v1248_v30, %v1247_v61  ;;  %v1508_v61 = vld [vmem:[#allocation4 + $0x60] sm:$0xff] }
 0x27a   :  { %v1250_v25 = vpop.f32.mrf.mxu0 }
 0x27b   :  { %v1097_v9 = vadd.f32 %v1496_v29, %v1249_v63 }
 0x27c   :  { %v1251_v53 = vpop.f32.mrf.mxu0 }
 0x27d   :  { %1148 = vst [vmem:[#allocation10] sm:$0xff] %v1097_v9  ;;  %v1252_v46 = vadd.f32 %v1251_v53, %v1250_v25  ;;  %v1509_v9 = vld [vmem:[#allocation4 + $0x68] sm:$0xff] }
 0x27e   :  { %v1253_v37 = vpop.f32.mrf.mxu0 }
 0x27f   :  { %v1098_v60 = vadd.f32 %v1497_v59, %v1252_v46 }
 0x280   :  { %v1254_v20 = vpop.f32.mrf.mxu0 }
 0x281   :  { %1149 = vst [vmem:[#allocation10 + $0x8] sm:$0xff] %v1098_v60  ;;  %v1255_v22 = vadd.f32 %v1254_v20, %v1253_v37  ;;  %v1510_v60 = vld [vmem:[#allocation4 + $0x70] sm:$0xff] }
 0x282   :  { %v1256_v50 = vpop.f32.mrf.mxu0 }
 0x283   :  { %v1099_v31 = vadd.f32 %v1498_v49, %v1255_v22  ;;  %v1511_v49 = vld [vmem:[#allocation4 + $0x78] sm:$0xff] }
 0x284   :  { %v1257_v11 = vpop.f32.mrf.mxu0 }
 0x285   :  { %1150 = vst [vmem:[#allocation10 + $0x10] sm:$0xff] %v1099_v31  ;;  %v1258_v14 = vadd.f32 %v1257_v11, %v1256_v50 }
 0x287   :  { %v1100_v34 = vadd.f32 %v1499_v32, %v1258_v14 }
 0x289   :  { %1151 = vst [vmem:[#allocation10 + $0x18] sm:$0xff] %v1100_v34 }
 0x290   :  { %v1259_v35 = vpop.f32.mrf.mxu0 }
 0x292   :  { %v1260_v26 = vpop.f32.mrf.mxu0 }
 0x293   :  { %v1261_v5 = vadd.f32 %v1260_v26, %v1259_v35 }
 0x295   :  { %v1101_v17 = vadd.f32 %v1500_v13, %v1261_v5 }
 0x296   :  { %v1262_v36 = vpop.f32.mrf.mxu0 }
 0x297   :  { %1152 = vst [vmem:[#allocation10 + $0x20] sm:$0xff] %v1101_v17 }
 0x298   :  { %v1263_v41 = vpop.f32.mrf.mxu0 }
 0x299   :  { %v1264_v16 = vadd.f32 %v1263_v41, %v1262_v36 }
 0x29a   :  { %v1265_v43 = vpop.f32.mrf.mxu0 }
 0x29b   :  { %v1102_v47 = vadd.f32 %v1501_v19, %v1264_v16 }
 0x29c   :  { %v1266_v48 = vpop.f32.mrf.mxu0 }
 0x29d   :  { %1153 = vst [vmem:[#allocation10 + $0x28] sm:$0xff] %v1102_v47  ;;  %v1267_v8 = vadd.f32 %v1266_v48, %v1265_v43 }
 0x29e   :  { %v1268_v21 = vpop.f32.mrf.mxu0 }
 0x29f   :  { %v1103_v51 = vadd.f32 %v1502_v23, %v1267_v8 }
 0x2a0   :  { %v1269_v42 = vpop.f32.mrf.mxu0 }
 0x2a1   :  { %1154 = vst [vmem:[#allocation10 + $0x30] sm:$0xff] %v1103_v51  ;;  %v1270_v1 = vadd.f32 %v1269_v42, %v1268_v21 }
 0x2a2   :  { %v1271_v62 = vpop.f32.mrf.mxu0 }
 0x2a3   :  { %v1104_v40 = vadd.f32 %v1503_v28, %v1270_v1 }
 0x2a4   :  { %v1272_v18 = vpop.f32.mrf.mxu0 }
 0x2a5   :  { %1155 = vst [vmem:[#allocation10 + $0x38] sm:$0xff] %v1104_v40  ;;  %v1273_v52 = vadd.f32 %v1272_v18, %v1271_v62 }
 0x2a6   :  { %v1274_v57 = vpop.f32.mrf.mxu0 }
 0x2a7   :  { %v1105_v58 = vadd.f32 %v1504_v54, %v1273_v52 }
 0x2a8   :  { %v1275_v56 = vpop.f32.mrf.mxu0 }
 0x2a9   :  { %1156 = vst [vmem:[#allocation10 + $0x40] sm:$0xff] %v1105_v58  ;;  %v1276_v12 = vadd.f32 %v1275_v56, %v1274_v57 }
 0x2aa   :  { %v1277_v27 = vpop.f32.mrf.mxu0 }
 0x2ab   :  { %v1106_v44 = vadd.f32 %v1505_v24, %v1276_v12 }
 0x2ac   :  { %v1278_v2 = vpop.f32.mrf.mxu0 }
 0x2ad   :  { %1157 = vst [vmem:[#allocation10 + $0x48] sm:$0xff] %v1106_v44  ;;  %v1279_v7 = vadd.f32 %v1278_v2, %v1277_v27 }
 0x2ae   :  { %v1280_v6 = vpop.f32.mrf.mxu0 }
 0x2af   :  { %v1107_v10 = vadd.f32 %v1506_v3, %v1279_v7 }
 0x2b0   :  { %v1281_v39 = vpop.f32.mrf.mxu0 }
 0x2b1   :  { %1158 = vst [vmem:[#allocation10 + $0x50] sm:$0xff] %v1107_v10  ;;  %v1282_v55 = vadd.f32 %v1281_v39, %v1280_v6 }
 0x2b2   :  { %v1283_v33 = vpop.f32.mrf.mxu0 }
 0x2b3   :  { %v1108_v38 = vadd.f32 %v1507_v15, %v1282_v55 }
 0x2b4   :  { %v1284_v45 = vpop.f32.mrf.mxu0 }
 0x2b5   :  { %1159 = vst [vmem:[#allocation10 + $0x58] sm:$0xff] %v1108_v38  ;;  %v1285_v0 = vadd.f32 %v1284_v45, %v1283_v33 }
 0x2b6   :  { %v1286_v4 = vpop.f32.mrf.mxu0 }
 0x2b7   :  { %v1109_v30 = vadd.f32 %v1508_v61, %v1285_v0 }
 0x2b8   :  { %v1287_v63 = vpop.f32.mrf.mxu0 }
 0x2b9   :  { %1160 = vst [vmem:[#allocation10 + $0x60] sm:$0xff] %v1109_v30  ;;  %v1288_v25 = vadd.f32 %v1287_v63, %v1286_v4 }
 0x2ba   :  { %v1289_v29 = vpop.f32.mrf.mxu0 }
 0x2bb   :  { %v1110_v53 = vadd.f32 %v1509_v9, %v1288_v25 }
 0x2bc   :  { %v1290_v46 = vpop.f32.mrf.mxu0 }
 0x2bd   :  { %1161 = vst [vmem:[#allocation10 + $0x68] sm:$0xff] %v1110_v53  ;;  %v1291_v37 = vadd.f32 %v1290_v46, %v1289_v29 }
 0x2be   :  { %v1292_v59 = vpop.f32.mrf.mxu0 }
 0x2bf   :  { %v1111_v20 = vadd.f32 %v1510_v60, %v1291_v37 }
 0x2c0   :  { %v1293_v22 = vpop.f32.mrf.mxu0 }
 0x2c1   :  { %1162 = vst [vmem:[#allocation10 + $0x70] sm:$0xff] %v1111_v20  ;;  %v1294_v50 = vadd.f32 %v1293_v22, %v1292_v59 }
 0x2c3   :  { %v1112_v31 = vadd.f32 %v1511_v49, %v1294_v50 }
 0x2c5   :  { %1163 = vst [vmem:[#allocation10 + $0x78] sm:$0xff] %v1112_v31 }
 0x2c6   :  { %1583 = shalt.err (!%p1580_p5)
}
 0x2c7   :  { %1175 = dma.vmem_to_hbm [thread:$0]  %s1170_s7, 2048, %s1991_s4, [#allocation6], %s1602_s25, %s1602_s25, %s1603_s26  }
 0x2c8   :  { %1596 = dma.done.wait [#allocation6], 2048  }
 0x2c9   :  { %1597 = vsyncadd [#allocation6], 4294965248 }
 0x2ca   :  { %1179 = vsyncpa [#allocation5], 1 }
 0x2cb   :  { %1180 = vsyncpa [#allocation8], 1 }
 0x2cc   :  { %1181 = vsyncpa [#allocation6], 1 }

</bundles_post_ra>
